<compile_context>
chip_gen: v7x
topology: tpu7x:2x2x1
jax: 0.10.0
libtpu: 0.0.40
codegen_flags: <defaults>
</compile_context>

<pallas_src>
import numpy as np
import jax
import jax.numpy as jnp
from jax import lax
from jax.experimental import pallas as pl
from jax.experimental.pallas import tpu as pltpu


# ----------------------------------------------------------------------------
# Fused Pallas kernel
# ----------------------------------------------------------------------------
def _gelu_exact(x):
    # nn.GELU() default: 0.5 * x * (1 + erf(x / sqrt(2)))
    return 0.5 * x * (1.0 + lax.erf(x * np.float32(1.0 / np.sqrt(2.0))))


def _conv_rows(in_ref, b_ref, c_ref):
    """3x3 conv (vertical taps as 3 shifted-row matmuls) over a row-stacked,
    row-padded activation buffer [R, W_in*C_in].

    b_ref[ky] is the banded [W_in*C_in, Wo*C_out] weight (horizontal taps,
    stride and zero padding folded in); c_ref is the bias row [1, Wo*C_out].
    Returns gelu(conv + bias) for every row window; rows that straddle image
    boundaries are junk and are discarded by the caller's selection matmul.
    """
    rows = in_ref.shape[0] - 2
    acc = jnp.dot(in_ref[pl.ds(0, rows), :], b_ref[0],
                  preferred_element_type=jnp.float32)
    acc += jnp.dot(in_ref[pl.ds(1, rows), :], b_ref[1],
                   preferred_element_type=jnp.float32)
    acc += jnp.dot(in_ref[pl.ds(2, rows), :], b_ref[2],
                   preferred_element_type=jnp.float32)
    # Bias broadcast emitted exactly once per layer (no loops -> no
    # re-emitted broadcast_in_dim).
    return _gelu_exact(acc + c_ref[...])


def _encoder_kernel(x_ref,
                    b1, c1, s1, b2, c2, s2, b3, c3, s3, b4, c4, s4, b5, c5, s5,
                    wl_ref, bl_ref,
                    o_ref,
                    buf1, buf2, buf3, buf4):
    f32 = jnp.float32
    # conv1..conv4: compute all row windows, then scatter the valid ones (and
    # exact zeros for the pad rows) into the next padded row-matrix buffer.
    buf1[...] = jnp.dot(s1[...], _conv_rows(x_ref, b1, c1),
                        preferred_element_type=f32)
    buf2[...] = jnp.dot(s2[...], _conv_rows(buf1, b2, c2),
                        preferred_element_type=f32)
    buf3[...] = jnp.dot(s3[...], _conv_rows(buf2, b3, c3),
                        preferred_element_type=f32)
    buf4[...] = jnp.dot(s4[...], _conv_rows(buf3, b4, c4),
                        preferred_element_type=f32)
    # conv5 + Flatten(NCHW) + Linear.  s5[h] picks output row h of every image;
    # wl_ref[h] is the matching slab of the permuted/transposed Linear weight,
    # so the NCHW flatten costs nothing.
    a5 = _conv_rows(buf4, b5, c5)                       # [N*Hp4 - 2, Wo5*C5]
    acc = jnp.dot(jnp.dot(s5[0], a5, preferred_element_type=f32),
                  wl_ref[0], preferred_element_type=f32)
    for h in range(1, wl_ref.shape[0]):
        acc += jnp.dot(jnp.dot(s5[h], a5, preferred_element_type=f32),
                       wl_ref[h], preferred_element_type=f32)
    o_ref[...] = (acc + bl_ref[...]).astype(o_ref.dtype)


# ----------------------------------------------------------------------------
# Build-time (init) weight folding -- all layout work is done ONCE here.
# ----------------------------------------------------------------------------
def _out_hw(size, stride):
    # Conv2d(kernel=3, padding=1): out = floor((size + 2 - 3) / stride) + 1
    return (size - 1) // stride + 1


def _banded_conv_weight(w_oihw, w_in, stride):
    """[3, W_in*C_in, Wo*C_out]: horizontal taps / stride / zero padding of a
    3x3 conv folded into one banded matrix per vertical tap ky."""
    w = np.asarray(w_oihw, np.float32)                  # [O, I, 3, 3]
    c_out, c_in = w.shape[0], w.shape[1]
    w_out = _out_hw(w_in, stride)
    B = np.zeros((3, w_in * c_in, w_out * c_out), np.float32)
    for ky in range(3):
        for wo in range(w_out):
            for kx in range(3):
                wi = wo * stride + kx - 1               # unpadded input column
                if 0 <= wi < w_in:
                    B[ky, wi * c_in:(wi + 1) * c_in,
                          wo * c_out:(wo + 1) * c_out] = w[:, :, ky, kx].T
    return B


def _row_select_padded(n, h_in, stride):
    """0/1 matrix scattering valid conv-output rows into the next row-padded
    buffer ([n*(Ho+2), n*(H_in+2)-2]); pad rows come out exactly zero."""
    hp_in, h_out = h_in + 2, _out_hw(h_in, stride)
    hp_out = h_out + 2
    S = np.zeros((n * hp_out, n * hp_in - 2), np.float32)
    for b in range(n):
        for ho in range(h_out):
            S[b * hp_out + 1 + ho, b * hp_in + ho * stride] = 1.0
    return S


def _row_select_per_h(n, h_in, stride):
    """[Ho, n, n*(H_in+2)-2]: S[h] picks output row h of every image."""
    hp_in, h_out = h_in + 2, _out_hw(h_in, stride)
    S = np.zeros((h_out, n, n * hp_in - 2), np.float32)
    for h in range(h_out):
        for b in range(n):
            S[h, b, b * hp_in + h * stride] = 1.0
    return S


def _folded_linear_weight(lin_w, c5, h5, w5):
    """[H5, W5*C5, n_z]: Linear weight transposed + permuted so the
    (h, w*C5+c) row-matrix layout multiplies it directly (NCHW flatten
    folded in)."""
    lw = np.asarray(lin_w, np.float32)                  # [n_z, C5*H5*W5]
    n_z = lw.shape[0]
    Wl = np.zeros((h5, w5 * c5, n_z), np.float32)
    for h in range(h5):
        for w in range(w5):
            for c in range(c5):
                Wl[h, w * c5 + c, :] = lw[:, c * h5 * w5 + h * w5 + w]
    return Wl


def build_encoder_forward(params, *, n_channel, p, t, n_z):
    """Returns a jitted forward(x_nchw) that runs the whole encoder as one
    fused Pallas kernel (all weight-layout folding precomputed here)."""
    strides = params["strides"]
    chans = [n_channel] + [w.shape[0] for (w, _) in params["convs"]]
    hs, ws = [p], [t]
    for s in strides:
        hs.append(_out_hw(hs[-1], s))
        ws.append(_out_hw(ws[-1], s))

    banded = [jnp.asarray(_banded_conv_weight(w, ws[i], strides[i]))
              for i, (w, _) in enumerate(params["convs"])]
    bias_rows = [jnp.asarray(np.tile(np.asarray(b, np.float32),
                                     ws[i + 1])[None, :])
                 for i, (_, b) in enumerate(params["convs"])]
    wl = jnp.asarray(_folded_linear_weight(params["lin_w"],
                                           chans[5], hs[5], ws[5]))
    bl = jnp.asarray(np.asarray(params["lin_b"], np.float32)[None, :])

    def forward(x_nchw):
        n = x_nchw.shape[0]
        # Batch-dependent 0/1 selection matrices (trace-time constants).
        sel = [jnp.asarray(_row_select_padded(n, hs[i], strides[i]))
               for i in range(4)]
        sel5 = jnp.asarray(_row_select_per_h(n, hs[4], strides[4]))

        # Input layout: NCHW -> row-stacked, row-padded row matrix.
        xr = jnp.transpose(x_nchw, (0, 2, 3, 1))                # [N, p, t, C]
        xr = jnp.pad(xr, ((0, 0), (1, 1), (0, 0), (0, 0)))      # zero pad rows
        xr = xr.reshape(n * (p + 2), t * n_channel).astype(jnp.float32)

        operands = [xr]
        for i in range(4):
            operands += [banded[i], bias_rows[i], sel[i]]
        operands += [banded[4], bias_rows[4], sel5, wl, bl]

        scratch = [pltpu.VMEM((n * (hs[i + 1] + 2), ws[i + 1] * chans[i + 1]),
                              jnp.float32) for i in range(4)]

        return pl.pallas_call(
            _encoder_kernel,
            out_shape=jax.ShapeDtypeStruct((n, n_z), jnp.float32),
            in_specs=[pl.BlockSpec(memory_space=pltpu.MemorySpace.VMEM)]
                     * len(operands),
            out_specs=pl.BlockSpec(memory_space=pltpu.MemorySpace.VMEM),
            scratch_shapes=scratch,
        )(*operands)

    return jax.jit(forward)


# ----------------------------------------------------------------------------
# Parameter init (PyTorch layouts) + pure-JAX reference for validation
# ----------------------------------------------------------------------------
def init_encoder_params(key, n_channel, c_hid, p, t, n_z):
    """Deterministic synthetic weights, PyTorch layouts: conv [O,I,kH,kW],
    linear [out,in]."""
    ks = jax.random.split(key, 12)
    conv_dims = [
        (n_channel, c_hid, 2),      # (in, out, stride)
        (c_hid, c_hid, 1),
        (c_hid, 2 * c_hid, 2),
        (2 * c_hid, 2 * c_hid, 1),
        (2 * c_hid, 2 * c_hid, 2),
    ]
    params = {"convs": [], "strides": []}
    for i, (cin, cout, s) in enumerate(conv_dims):
        w = 0.05 * jax.random.normal(ks[2 * i], (cout, cin, 3, 3), jnp.float32)
        b = 0.05 * jax.random.normal(ks[2 * i + 1], (cout,), jnp.float32)
        params["convs"].append((w, b))
        params["strides"].append(s)
    lin_in = 2 * (p // 8) * (t // 8) * c_hid
    params["lin_w"] = 0.05 * jax.random.normal(ks[10], (n_z, lin_in), jnp.float32)
    params["lin_b"] = 0.05 * jax.random.normal(ks[11], (n_z,), jnp.float32)
    return params


def encoder_forward_ref(params, x_nchw):
    x = x_nchw
    for (w, b), s in zip(params["convs"], params["strides"]):
        x = lax.conv_general_dilated(
            x, w, window_strides=(s, s), padding=((1, 1), (1, 1)),
            dimension_numbers=("NCHW", "OIHW", "NCHW"))
        x = jax.nn.gelu(x + b.reshape(1, -1, 1, 1), approximate=False)
    x = x.reshape(x.shape[0], -1)
    return x @ params["lin_w"].T + params["lin_b"]


if __name__ == "__main__":
    # Small hp: n_channel=4, dim_h (c_hid)=8, n_z=32, image p x t = 16 x 16
    n_channel, c_hid, n_z = 4, 8, 32
    p = t = 16
    batch = 2

    key = jax.random.PRNGKey(0)
    k_param, k_x = jax.random.split(key)
    params = init_encoder_params(k_param, n_channel, c_hid, p, t, n_z)
    x = jax.random.normal(k_x, (batch, n_channel, p, t), jnp.float32)

    forward = build_encoder_forward(params, n_channel=n_channel, p=p, t=t,
                                    n_z=n_z)
    out = jax.block_until_ready(forward(x))
    ref = jax.block_until_ready(encoder_forward_ref(params, x))

    assert out.shape == (batch, n_z), out.shape
    assert jnp.allclose(out, ref, atol=1e-3, rtol=1e-3), float(
        jnp.max(jnp.abs(out - ref)))
    print("KERNEL_OK")
</pallas_src>

<mosaic_0001>
module attributes {stable_mosaic.version = 11 : i64} {
  func.func @_encoder_kernel(%arg0: memref<36x64xf32, #tpu.memory_space<vmem>>, %arg1: memref<3x64x64xf32, #tpu.memory_space<vmem>>, %arg2: memref<1x64xf32, #tpu.memory_space<vmem>>, %arg3: memref<20x34xf32, #tpu.memory_space<vmem>>, %arg4: memref<3x64x64xf32, #tpu.memory_space<vmem>>, %arg5: memref<1x64xf32, #tpu.memory_space<vmem>>, %arg6: memref<20x18xf32, #tpu.memory_space<vmem>>, %arg7: memref<3x64x64xf32, #tpu.memory_space<vmem>>, %arg8: memref<1x64xf32, #tpu.memory_space<vmem>>, %arg9: memref<12x18xf32, #tpu.memory_space<vmem>>, %arg10: memref<3x64x64xf32, #tpu.memory_space<vmem>>, %arg11: memref<1x64xf32, #tpu.memory_space<vmem>>, %arg12: memref<12x10xf32, #tpu.memory_space<vmem>>, %arg13: memref<3x64x32xf32, #tpu.memory_space<vmem>>, %arg14: memref<1x32xf32, #tpu.memory_space<vmem>>, %arg15: memref<2x2x10xf32, #tpu.memory_space<vmem>>, %arg16: memref<2x32x32xf32, #tpu.memory_space<vmem>>, %arg17: memref<1x32xf32, #tpu.memory_space<vmem>>, %arg18: memref<2x32xf32, #tpu.memory_space<vmem>>, %arg19: memref<20x64xf32, #tpu.memory_space<vmem>>, %arg20: memref<20x64xf32, #tpu.memory_space<vmem>>, %arg21: memref<12x64xf32, #tpu.memory_space<vmem>>, %arg22: memref<12x64xf32, #tpu.memory_space<vmem>>) attributes {dimension_semantics = [], scalar_prefetch = 0 : i64, scratch_operands = 4 : i64, tpu.core_type = #tpu.core_type<tc>} {
    %c0 = arith.constant 0 : index
    %c0_0 = arith.constant 0 : index
    %0 = vector.load %arg3[%c0, %c0_0] : memref<20x34xf32, #tpu.memory_space<vmem>>, vector<20x34xf32>
    %c0_1 = arith.constant 0 : index
    %c0_2 = arith.constant 0 : index
    %1 = vector.load %arg0[%c0_1, %c0_2] : memref<36x64xf32, #tpu.memory_space<vmem>>, vector<34x64xf32>
    %c0_3 = arith.constant 0 : index
    %c0_4 = arith.constant 0 : index
    %c0_5 = arith.constant 0 : index
    %2 = vector.load %arg1[%c0_3, %c0_4, %c0_5] : memref<3x64x64xf32, #tpu.memory_space<vmem>>, vector<1x64x64xf32>
    %3 = vector.shape_cast %2 : vector<1x64x64xf32> to vector<64x64xf32>
    %cst = arith.constant dense<0.000000e+00> : vector<34x64xf32>
    %4 = tpu.matmul %1, %3, %cst {dimension_numbers = #tpu.dot_dimension_numbers<[1], [0], [0], [1], [0, 0, 1, 1], [], []>} : vector<34x64xf32>, vector<64x64xf32>, vector<34x64xf32> -> vector<34x64xf32>
    %c1 = arith.constant 1 : index
    %c0_6 = arith.constant 0 : index
    %5 = vector.load %arg0[%c1, %c0_6] : memref<36x64xf32, #tpu.memory_space<vmem>>, vector<34x64xf32>
    %c1_7 = arith.constant 1 : index
    %c0_8 = arith.constant 0 : index
    %c0_9 = arith.constant 0 : index
    %6 = vector.load %arg1[%c1_7, %c0_8, %c0_9] : memref<3x64x64xf32, #tpu.memory_space<vmem>>, vector<1x64x64xf32>
    %7 = vector.shape_cast %6 : vector<1x64x64xf32> to vector<64x64xf32>
    %cst_10 = arith.constant dense<0.000000e+00> : vector<34x64xf32>
    %8 = tpu.matmul %5, %7, %cst_10 {dimension_numbers = #tpu.dot_dimension_numbers<[1], [0], [0], [1], [0, 0, 1, 1], [], []>} : vector<34x64xf32>, vector<64x64xf32>, vector<34x64xf32> -> vector<34x64xf32>
    %9 = arith.addf %4, %8 : vector<34x64xf32>
    %c2 = arith.constant 2 : index
    %c0_11 = arith.constant 0 : index
    %10 = vector.load %arg0[%c2, %c0_11] : memref<36x64xf32, #tpu.memory_space<vmem>>, vector<34x64xf32>
    %c2_12 = arith.constant 2 : index
    %c0_13 = arith.constant 0 : index
    %c0_14 = arith.constant 0 : index
    %11 = vector.load %arg1[%c2_12, %c0_13, %c0_14] : memref<3x64x64xf32, #tpu.memory_space<vmem>>, vector<1x64x64xf32>
    %12 = vector.shape_cast %11 : vector<1x64x64xf32> to vector<64x64xf32>
    %cst_15 = arith.constant dense<0.000000e+00> : vector<34x64xf32>
    %13 = tpu.matmul %10, %12, %cst_15 {dimension_numbers = #tpu.dot_dimension_numbers<[1], [0], [0], [1], [0, 0, 1, 1], [], []>} : vector<34x64xf32>, vector<64x64xf32>, vector<34x64xf32> -> vector<34x64xf32>
    %14 = arith.addf %9, %13 : vector<34x64xf32>
    %c0_16 = arith.constant 0 : index
    %c0_17 = arith.constant 0 : index
    %15 = vector.load %arg2[%c0_16, %c0_17] : memref<1x64xf32, #tpu.memory_space<vmem>>, vector<1x64xf32>
    %16 = vector.broadcast %15 : vector<1x64xf32> to vector<34x64xf32>
    %17 = arith.addf %14, %16 : vector<34x64xf32>
    %cst_18 = arith.constant 5.000000e-01 : f32
    %18 = vector.broadcast %cst_18 : f32 to vector<34x64xf32>
    %19 = arith.mulf %18, %17 : vector<34x64xf32>
    %cst_19 = arith.constant 0.707106769 : f32
    %20 = vector.broadcast %cst_19 : f32 to vector<34x64xf32>
    %21 = arith.mulf %17, %20 : vector<34x64xf32>
    %22 = math.erf %21 : vector<34x64xf32>
    %cst_20 = arith.constant 1.000000e+00 : f32
    %23 = vector.broadcast %cst_20 : f32 to vector<34x64xf32>
    %24 = arith.addf %23, %22 : vector<34x64xf32>
    %25 = arith.mulf %19, %24 : vector<34x64xf32>
    %cst_21 = arith.constant dense<0.000000e+00> : vector<20x64xf32>
    %26 = tpu.matmul %0, %25, %cst_21 {dimension_numbers = #tpu.dot_dimension_numbers<[1], [0], [0], [1], [0, 0, 1, 1], [], []>} : vector<20x34xf32>, vector<34x64xf32>, vector<20x64xf32> -> vector<20x64xf32>
    %c0_22 = arith.constant 0 : index
    %c0_23 = arith.constant 0 : index
    %27 = vector.load %arg19[%c0_22, %c0_23] : memref<20x64xf32, #tpu.memory_space<vmem>>, vector<20x64xf32>
    tpu.vector_store %arg19[%c0_22, %c0_23], %26 {strides = array<i32>} : memref<20x64xf32, #tpu.memory_space<vmem>>, vector<20x64xf32>,
    %c0_24 = arith.constant 0 : index
    %c0_25 = arith.constant 0 : index
    %28 = vector.load %arg6[%c0_24, %c0_25] : memref<20x18xf32, #tpu.memory_space<vmem>>, vector<20x18xf32>
    %c0_26 = arith.constant 0 : index
    %c0_27 = arith.constant 0 : index
    %29 = vector.load %arg19[%c0_26, %c0_27] : memref<20x64xf32, #tpu.memory_space<vmem>>, vector<18x64xf32>
    %c0_28 = arith.constant 0 : index
    %c0_29 = arith.constant 0 : index
    %c0_30 = arith.constant 0 : index
    %30 = vector.load %arg4[%c0_28, %c0_29, %c0_30] : memref<3x64x64xf32, #tpu.memory_space<vmem>>, vector<1x64x64xf32>
    %31 = vector.shape_cast %30 : vector<1x64x64xf32> to vector<64x64xf32>
    %cst_31 = arith.constant dense<0.000000e+00> : vector<18x64xf32>
    %32 = tpu.matmul %29, %31, %cst_31 {dimension_numbers = #tpu.dot_dimension_numbers<[1], [0], [0], [1], [0, 0, 1, 1], [], []>} : vector<18x64xf32>, vector<64x64xf32>, vector<18x64xf32> -> vector<18x64xf32>
    %c1_32 = arith.constant 1 : index
    %c0_33 = arith.constant 0 : index
    %33 = vector.load %arg19[%c1_32, %c0_33] : memref<20x64xf32, #tpu.memory_space<vmem>>, vector<18x64xf32>
    %c1_34 = arith.constant 1 : index
    %c0_35 = arith.constant 0 : index
    %c0_36 = arith.constant 0 : index
    %34 = vector.load %arg4[%c1_34, %c0_35, %c0_36] : memref<3x64x64xf32, #tpu.memory_space<vmem>>, vector<1x64x64xf32>
    %35 = vector.shape_cast %34 : vector<1x64x64xf32> to vector<64x64xf32>
    %cst_37 = arith.constant dense<0.000000e+00> : vector<18x64xf32>
    %36 = tpu.matmul %33, %35, %cst_37 {dimension_numbers = #tpu.dot_dimension_numbers<[1], [0], [0], [1], [0, 0, 1, 1], [], []>} : vector<18x64xf32>, vector<64x64xf32>, vector<18x64xf32> -> vector<18x64xf32>
    %37 = arith.addf %32, %36 : vector<18x64xf32>
    %c2_38 = arith.constant 2 : index
    %c0_39 = arith.constant 0 : index
    %38 = vector.load %arg19[%c2_38, %c0_39] : memref<20x64xf32, #tpu.memory_space<vmem>>, vector<18x64xf32>
    %c2_40 = arith.constant 2 : index
    %c0_41 = arith.constant 0 : index
    %c0_42 = arith.constant 0 : index
    %39 = vector.load %arg4[%c2_40, %c0_41, %c0_42] : memref<3x64x64xf32, #tpu.memory_space<vmem>>, vector<1x64x64xf32>
    %40 = vector.shape_cast %39 : vector<1x64x64xf32> to vector<64x64xf32>
    %cst_43 = arith.constant dense<0.000000e+00> : vector<18x64xf32>
    %41 = tpu.matmul %38, %40, %cst_43 {dimension_numbers = #tpu.dot_dimension_numbers<[1], [0], [0], [1], [0, 0, 1, 1], [], []>} : vector<18x64xf32>, vector<64x64xf32>, vector<18x64xf32> -> vector<18x64xf32>
    %42 = arith.addf %37, %41 : vector<18x64xf32>
    %c0_44 = arith.constant 0 : index
    %c0_45 = arith.constant 0 : index
    %43 = vector.load %arg5[%c0_44, %c0_45] : memref<1x64xf32, #tpu.memory_space<vmem>>, vector<1x64xf32>
    %44 = vector.broadcast %43 : vector<1x64xf32> to vector<18x64xf32>
    %45 = arith.addf %42, %44 : vector<18x64xf32>
    %cst_46 = arith.constant 5.000000e-01 : f32
    %46 = vector.broadcast %cst_46 : f32 to vector<18x64xf32>
    %47 = arith.mulf %46, %45 : vector<18x64xf32>
    %cst_47 = arith.constant 0.707106769 : f32
    %48 = vector.broadcast %cst_47 : f32 to vector<18x64xf32>
    %49 = arith.mulf %45, %48 : vector<18x64xf32>
    %50 = math.erf %49 : vector<18x64xf32>
    %cst_48 = arith.constant 1.000000e+00 : f32
    %51 = vector.broadcast %cst_48 : f32 to vector<18x64xf32>
    %52 = arith.addf %51, %50 : vector<18x64xf32>
    %53 = arith.mulf %47, %52 : vector<18x64xf32>
    %cst_49 = arith.constant dense<0.000000e+00> : vector<20x64xf32>
    %54 = tpu.matmul %28, %53, %cst_49 {dimension_numbers = #tpu.dot_dimension_numbers<[1], [0], [0], [1], [0, 0, 1, 1], [], []>} : vector<20x18xf32>, vector<18x64xf32>, vector<20x64xf32> -> vector<20x64xf32>
    %c0_50 = arith.constant 0 : index
    %c0_51 = arith.constant 0 : index
    %55 = vector.load %arg20[%c0_50, %c0_51] : memref<20x64xf32, #tpu.memory_space<vmem>>, vector<20x64xf32>
    tpu.vector_store %arg20[%c0_50, %c0_51], %54 {strides = array<i32>} : memref<20x64xf32, #tpu.memory_space<vmem>>, vector<20x64xf32>,
    %c0_52 = arith.constant 0 : index
    %c0_53 = arith.constant 0 : index
    %56 = vector.load %arg9[%c0_52, %c0_53] : memref<12x18xf32, #tpu.memory_space<vmem>>, vector<12x18xf32>
    %c0_54 = arith.constant 0 : index
    %c0_55 = arith.constant 0 : index
    %57 = vector.load %arg20[%c0_54, %c0_55] : memref<20x64xf32, #tpu.memory_space<vmem>>, vector<18x64xf32>
    %c0_56 = arith.constant 0 : index
    %c0_57 = arith.constant 0 : index
    %c0_58 = arith.constant 0 : index
    %58 = vector.load %arg7[%c0_56, %c0_57, %c0_58] : memref<3x64x64xf32, #tpu.memory_space<vmem>>, vector<1x64x64xf32>
    %59 = vector.shape_cast %58 : vector<1x64x64xf32> to vector<64x64xf32>
    %cst_59 = arith.constant dense<0.000000e+00> : vector<18x64xf32>
    %60 = tpu.matmul %57, %59, %cst_59 {dimension_numbers = #tpu.dot_dimension_numbers<[1], [0], [0], [1], [0, 0, 1, 1], [], []>} : vector<18x64xf32>, vector<64x64xf32>, vector<18x64xf32> -> vector<18x64xf32>
    %c1_60 = arith.constant 1 : index
    %c0_61 = arith.constant 0 : index
    %61 = vector.load %arg20[%c1_60, %c0_61] : memref<20x64xf32, #tpu.memory_space<vmem>>, vector<18x64xf32>
    %c1_62 = arith.constant 1 : index
    %c0_63 = arith.constant 0 : index
    %c0_64 = arith.constant 0 : index
    %62 = vector.load %arg7[%c1_62, %c0_63, %c0_64] : memref<3x64x64xf32, #tpu.memory_space<vmem>>, vector<1x64x64xf32>
    %63 = vector.shape_cast %62 : vector<1x64x64xf32> to vector<64x64xf32>
    %cst_65 = arith.constant dense<0.000000e+00> : vector<18x64xf32>
    %64 = tpu.matmul %61, %63, %cst_65 {dimension_numbers = #tpu.dot_dimension_numbers<[1], [0], [0], [1], [0, 0, 1, 1], [], []>} : vector<18x64xf32>, vector<64x64xf32>, vector<18x64xf32> -> vector<18x64xf32>
    %65 = arith.addf %60, %64 : vector<18x64xf32>
    %c2_66 = arith.constant 2 : index
    %c0_67 = arith.constant 0 : index
    %66 = vector.load %arg20[%c2_66, %c0_67] : memref<20x64xf32, #tpu.memory_space<vmem>>, vector<18x64xf32>
    %c2_68 = arith.constant 2 : index
    %c0_69 = arith.constant 0 : index
    %c0_70 = arith.constant 0 : index
    %67 = vector.load %arg7[%c2_68, %c0_69, %c0_70] : memref<3x64x64xf32, #tpu.memory_space<vmem>>, vector<1x64x64xf32>
    %68 = vector.shape_cast %67 : vector<1x64x64xf32> to vector<64x64xf32>
    %cst_71 = arith.constant dense<0.000000e+00> : vector<18x64xf32>
    %69 = tpu.matmul %66, %68, %cst_71 {dimension_numbers = #tpu.dot_dimension_numbers<[1], [0], [0], [1], [0, 0, 1, 1], [], []>} : vector<18x64xf32>, vector<64x64xf32>, vector<18x64xf32> -> vector<18x64xf32>
    %70 = arith.addf %65, %69 : vector<18x64xf32>
    %c0_72 = arith.constant 0 : index
    %c0_73 = arith.constant 0 : index
    %71 = vector.load %arg8[%c0_72, %c0_73] : memref<1x64xf32, #tpu.memory_space<vmem>>, vector<1x64xf32>
    %72 = vector.broadcast %71 : vector<1x64xf32> to vector<18x64xf32>
    %73 = arith.addf %70, %72 : vector<18x64xf32>
    %cst_74 = arith.constant 5.000000e-01 : f32
    %74 = vector.broadcast %cst_74 : f32 to vector<18x64xf32>
    %75 = arith.mulf %74, %73 : vector<18x64xf32>
    %cst_75 = arith.constant 0.707106769 : f32
    %76 = vector.broadcast %cst_75 : f32 to vector<18x64xf32>
    %77 = arith.mulf %73, %76 : vector<18x64xf32>
    %78 = math.erf %77 : vector<18x64xf32>
    %cst_76 = arith.constant 1.000000e+00 : f32
    %79 = vector.broadcast %cst_76 : f32 to vector<18x64xf32>
    %80 = arith.addf %79, %78 : vector<18x64xf32>
    %81 = arith.mulf %75, %80 : vector<18x64xf32>
    %cst_77 = arith.constant dense<0.000000e+00> : vector<12x64xf32>
    %82 = tpu.matmul %56, %81, %cst_77 {dimension_numbers = #tpu.dot_dimension_numbers<[1], [0], [0], [1], [0, 0, 1, 1], [], []>} : vector<12x18xf32>, vector<18x64xf32>, vector<12x64xf32> -> vector<12x64xf32>
    %c0_78 = arith.constant 0 : index
    %c0_79 = arith.constant 0 : index
    %83 = vector.load %arg21[%c0_78, %c0_79] : memref<12x64xf32, #tpu.memory_space<vmem>>, vector<12x64xf32>
    tpu.vector_store %arg21[%c0_78, %c0_79], %82 {strides = array<i32>} : memref<12x64xf32, #tpu.memory_space<vmem>>, vector<12x64xf32>,
    %c0_80 = arith.constant 0 : index
    %c0_81 = arith.constant 0 : index
    %84 = vector.load %arg12[%c0_80, %c0_81] : memref<12x10xf32, #tpu.memory_space<vmem>>, vector<12x10xf32>
    %c0_82 = arith.constant 0 : index
    %c0_83 = arith.constant 0 : index
    %85 = vector.load %arg21[%c0_82, %c0_83] : memref<12x64xf32, #tpu.memory_space<vmem>>, vector<10x64xf32>
    %c0_84 = arith.constant 0 : index
    %c0_85 = arith.constant 0 : index
    %c0_86 = arith.constant 0 : index
    %86 = vector.load %arg10[%c0_84, %c0_85, %c0_86] : memref<3x64x64xf32, #tpu.memory_space<vmem>>, vector<1x64x64xf32>
    %87 = vector.shape_cast %86 : vector<1x64x64xf32> to vector<64x64xf32>
    %cst_87 = arith.constant dense<0.000000e+00> : vector<10x64xf32>
    %88 = tpu.matmul %85, %87, %cst_87 {dimension_numbers = #tpu.dot_dimension_numbers<[1], [0], [0], [1], [0, 0, 1, 1], [], []>} : vector<10x64xf32>, vector<64x64xf32>, vector<10x64xf32> -> vector<10x64xf32>
    %c1_88 = arith.constant 1 : index
    %c0_89 = arith.constant 0 : index
    %89 = vector.load %arg21[%c1_88, %c0_89] : memref<12x64xf32, #tpu.memory_space<vmem>>, vector<10x64xf32>
    %c1_90 = arith.constant 1 : index
    %c0_91 = arith.constant 0 : index
    %c0_92 = arith.constant 0 : index
    %90 = vector.load %arg10[%c1_90, %c0_91, %c0_92] : memref<3x64x64xf32, #tpu.memory_space<vmem>>, vector<1x64x64xf32>
    %91 = vector.shape_cast %90 : vector<1x64x64xf32> to vector<64x64xf32>
    %cst_93 = arith.constant dense<0.000000e+00> : vector<10x64xf32>
    %92 = tpu.matmul %89, %91, %cst_93 {dimension_numbers = #tpu.dot_dimension_numbers<[1], [0], [0], [1], [0, 0, 1, 1], [], []>} : vector<10x64xf32>, vector<64x64xf32>, vector<10x64xf32> -> vector<10x64xf32>
    %93 = arith.addf %88, %92 : vector<10x64xf32>
    %c2_94 = arith.constant 2 : index
    %c0_95 = arith.constant 0 : index
    %94 = vector.load %arg21[%c2_94, %c0_95] : memref<12x64xf32, #tpu.memory_space<vmem>>, vector<10x64xf32>
    %c2_96 = arith.constant 2 : index
    %c0_97 = arith.constant 0 : index
    %c0_98 = arith.constant 0 : index
    %95 = vector.load %arg10[%c2_96, %c0_97, %c0_98] : memref<3x64x64xf32, #tpu.memory_space<vmem>>, vector<1x64x64xf32>
    %96 = vector.shape_cast %95 : vector<1x64x64xf32> to vector<64x64xf32>
    %cst_99 = arith.constant dense<0.000000e+00> : vector<10x64xf32>
    %97 = tpu.matmul %94, %96, %cst_99 {dimension_numbers = #tpu.dot_dimension_numbers<[1], [0], [0], [1], [0, 0, 1, 1], [], []>} : vector<10x64xf32>, vector<64x64xf32>, vector<10x64xf32> -> vector<10x64xf32>
    %98 = arith.addf %93, %97 : vector<10x64xf32>
    %c0_100 = arith.constant 0 : index
    %c0_101 = arith.constant 0 : index
    %99 = vector.load %arg11[%c0_100, %c0_101] : memref<1x64xf32, #tpu.memory_space<vmem>>, vector<1x64xf32>
    %100 = vector.broadcast %99 : vector<1x64xf32> to vector<10x64xf32>
    %101 = arith.addf %98, %100 : vector<10x64xf32>
    %cst_102 = arith.constant 5.000000e-01 : f32
    %102 = vector.broadcast %cst_102 : f32 to vector<10x64xf32>
    %103 = arith.mulf %102, %101 : vector<10x64xf32>
    %cst_103 = arith.constant 0.707106769 : f32
    %104 = vector.broadcast %cst_103 : f32 to vector<10x64xf32>
    %105 = arith.mulf %101, %104 : vector<10x64xf32>
    %106 = math.erf %105 : vector<10x64xf32>
    %cst_104 = arith.constant 1.000000e+00 : f32
    %107 = vector.broadcast %cst_104 : f32 to vector<10x64xf32>
    %108 = arith.addf %107, %106 : vector<10x64xf32>
    %109 = arith.mulf %103, %108 : vector<10x64xf32>
    %cst_105 = arith.constant dense<0.000000e+00> : vector<12x64xf32>
    %110 = tpu.matmul %84, %109, %cst_105 {dimension_numbers = #tpu.dot_dimension_numbers<[1], [0], [0], [1], [0, 0, 1, 1], [], []>} : vector<12x10xf32>, vector<10x64xf32>, vector<12x64xf32> -> vector<12x64xf32>
    %c0_106 = arith.constant 0 : index
    %c0_107 = arith.constant 0 : index
    %111 = vector.load %arg22[%c0_106, %c0_107] : memref<12x64xf32, #tpu.memory_space<vmem>>, vector<12x64xf32>
    tpu.vector_store %arg22[%c0_106, %c0_107], %110 {strides = array<i32>} : memref<12x64xf32, #tpu.memory_space<vmem>>, vector<12x64xf32>,
    %c0_108 = arith.constant 0 : index
    %c0_109 = arith.constant 0 : index
    %112 = vector.load %arg22[%c0_108, %c0_109] : memref<12x64xf32, #tpu.memory_space<vmem>>, vector<10x64xf32>
    %c0_110 = arith.constant 0 : index
    %c0_111 = arith.constant 0 : index
    %c0_112 = arith.constant 0 : index
    %113 = vector.load %arg13[%c0_110, %c0_111, %c0_112] : memref<3x64x32xf32, #tpu.memory_space<vmem>>, vector<1x64x32xf32>
    %114 = vector.shape_cast %113 : vector<1x64x32xf32> to vector<64x32xf32>
    %cst_113 = arith.constant dense<0.000000e+00> : vector<10x32xf32>
    %115 = tpu.matmul %112, %114, %cst_113 {dimension_numbers = #tpu.dot_dimension_numbers<[1], [0], [0], [1], [0, 0, 1, 1], [], []>} : vector<10x64xf32>, vector<64x32xf32>, vector<10x32xf32> -> vector<10x32xf32>
    %c1_114 = arith.constant 1 : index
    %c0_115 = arith.constant 0 : index
    %116 = vector.load %arg22[%c1_114, %c0_115] : memref<12x64xf32, #tpu.memory_space<vmem>>, vector<10x64xf32>
    %c1_116 = arith.constant 1 : index
    %c0_117 = arith.constant 0 : index
    %c0_118 = arith.constant 0 : index
    %117 = vector.load %arg13[%c1_116, %c0_117, %c0_118] : memref<3x64x32xf32, #tpu.memory_space<vmem>>, vector<1x64x32xf32>
    %118 = vector.shape_cast %117 : vector<1x64x32xf32> to vector<64x32xf32>
    %cst_119 = arith.constant dense<0.000000e+00> : vector<10x32xf32>
    %119 = tpu.matmul %116, %118, %cst_119 {dimension_numbers = #tpu.dot_dimension_numbers<[1], [0], [0], [1], [0, 0, 1, 1], [], []>} : vector<10x64xf32>, vector<64x32xf32>, vector<10x32xf32> -> vector<10x32xf32>
    %120 = arith.addf %115, %119 : vector<10x32xf32>
    %c2_120 = arith.constant 2 : index
    %c0_121 = arith.constant 0 : index
    %121 = vector.load %arg22[%c2_120, %c0_121] : memref<12x64xf32, #tpu.memory_space<vmem>>, vector<10x64xf32>
    %c2_122 = arith.constant 2 : index
    %c0_123 = arith.constant 0 : index
    %c0_124 = arith.constant 0 : index
    %122 = vector.load %arg13[%c2_122, %c0_123, %c0_124] : memref<3x64x32xf32, #tpu.memory_space<vmem>>, vector<1x64x32xf32>
    %123 = vector.shape_cast %122 : vector<1x64x32xf32> to vector<64x32xf32>
    %cst_125 = arith.constant dense<0.000000e+00> : vector<10x32xf32>
    %124 = tpu.matmul %121, %123, %cst_125 {dimension_numbers = #tpu.dot_dimension_numbers<[1], [0], [0], [1], [0, 0, 1, 1], [], []>} : vector<10x64xf32>, vector<64x32xf32>, vector<10x32xf32> -> vector<10x32xf32>
    %125 = arith.addf %120, %124 : vector<10x32xf32>
    %c0_126 = arith.constant 0 : index
    %c0_127 = arith.constant 0 : index
    %126 = vector.load %arg14[%c0_126, %c0_127] : memref<1x32xf32, #tpu.memory_space<vmem>>, vector<1x32xf32>
    %127 = vector.broadcast %126 : vector<1x32xf32> to vector<10x32xf32>
    %128 = arith.addf %125, %127 : vector<10x32xf32>
    %cst_128 = arith.constant 5.000000e-01 : f32
    %129 = vector.broadcast %cst_128 : f32 to vector<10x32xf32>
    %130 = arith.mulf %129, %128 : vector<10x32xf32>
    %cst_129 = arith.constant 0.707106769 : f32
    %131 = vector.broadcast %cst_129 : f32 to vector<10x32xf32>
    %132 = arith.mulf %128, %131 : vector<10x32xf32>
    %133 = math.erf %132 : vector<10x32xf32>
    %cst_130 = arith.constant 1.000000e+00 : f32
    %134 = vector.broadcast %cst_130 : f32 to vector<10x32xf32>
    %135 = arith.addf %134, %133 : vector<10x32xf32>
    %136 = arith.mulf %130, %135 : vector<10x32xf32>
    %c0_131 = arith.constant 0 : index
    %c0_132 = arith.constant 0 : index
    %c0_133 = arith.constant 0 : index
    %137 = vector.load %arg15[%c0_131, %c0_132, %c0_133] : memref<2x2x10xf32, #tpu.memory_space<vmem>>, vector<1x2x10xf32>
    %138 = vector.shape_cast %137 : vector<1x2x10xf32> to vector<2x10xf32>
    %cst_134 = arith.constant dense<0.000000e+00> : vector<2x32xf32>
    %139 = tpu.matmul %138, %136, %cst_134 {dimension_numbers = #tpu.dot_dimension_numbers<[1], [0], [0], [1], [0, 0, 1, 1], [], []>} : vector<2x10xf32>, vector<10x32xf32>, vector<2x32xf32> -> vector<2x32xf32>
    %c0_135 = arith.constant 0 : index
    %c0_136 = arith.constant 0 : index
    %c0_137 = arith.constant 0 : index
    %140 = vector.load %arg16[%c0_135, %c0_136, %c0_137] : memref<2x32x32xf32, #tpu.memory_space<vmem>>, vector<1x32x32xf32>
    %141 = vector.shape_cast %140 : vector<1x32x32xf32> to vector<32x32xf32>
    %cst_138 = arith.constant dense<0.000000e+00> : vector<2x32xf32>
    %142 = tpu.matmul %139, %141, %cst_138 {dimension_numbers = #tpu.dot_dimension_numbers<[1], [0], [0], [1], [0, 0, 1, 1], [], []>} : vector<2x32xf32>, vector<32x32xf32>, vector<2x32xf32> -> vector<2x32xf32>
    %c1_139 = arith.constant 1 : index
    %c0_140 = arith.constant 0 : index
    %c0_141 = arith.constant 0 : index
    %143 = vector.load %arg15[%c1_139, %c0_140, %c0_141] : memref<2x2x10xf32, #tpu.memory_space<vmem>>, vector<1x2x10xf32>
    %144 = vector.shape_cast %143 : vector<1x2x10xf32> to vector<2x10xf32>
    %cst_142 = arith.constant dense<0.000000e+00> : vector<2x32xf32>
    %145 = tpu.matmul %144, %136, %cst_142 {dimension_numbers = #tpu.dot_dimension_numbers<[1], [0], [0], [1], [0, 0, 1, 1], [], []>} : vector<2x10xf32>, vector<10x32xf32>, vector<2x32xf32> -> vector<2x32xf32>
    %c1_143 = arith.constant 1 : index
    %c0_144 = arith.constant 0 : index
    %c0_145 = arith.constant 0 : index
    %146 = vector.load %arg16[%c1_143, %c0_144, %c0_145] : memref<2x32x32xf32, #tpu.memory_space<vmem>>, vector<1x32x32xf32>
    %147 = vector.shape_cast %146 : vector<1x32x32xf32> to vector<32x32xf32>
    %cst_146 = arith.constant dense<0.000000e+00> : vector<2x32xf32>
    %148 = tpu.matmul %145, %147, %cst_146 {dimension_numbers = #tpu.dot_dimension_numbers<[1], [0], [0], [1], [0, 0, 1, 1], [], []>} : vector<2x32xf32>, vector<32x32xf32>, vector<2x32xf32> -> vector<2x32xf32>
    %149 = arith.addf %142, %148 : vector<2x32xf32>
    %c0_147 = arith.constant 0 : index
    %c0_148 = arith.constant 0 : index
    %150 = vector.load %arg17[%c0_147, %c0_148] : memref<1x32xf32, #tpu.memory_space<vmem>>, vector<1x32xf32>
    %151 = vector.broadcast %150 : vector<1x32xf32> to vector<2x32xf32>
    %152 = arith.addf %149, %151 : vector<2x32xf32>
    %c0_149 = arith.constant 0 : index
    %c0_150 = arith.constant 0 : index
    %153 = vector.load %arg18[%c0_149, %c0_150] : memref<2x32xf32, #tpu.memory_space<vmem>>, vector<2x32xf32>
    tpu.vector_store %arg18[%c0_149, %c0_150], %152 {strides = array<i32>} : memref<2x32xf32, #tpu.memory_space<vmem>>, vector<2x32xf32>,
    return
  }
}

</mosaic_0001>

<bundles_post_ra>
// kernel: forward.1
= control target key start
LH: loop header
LB: loop body
LE: loop exit
PB: predicated region body
PF: predicated region fallthrough
CT: control target
= control target key end

     0   :  { %s4514_s0 = inlined_call_operand.vmem [shape: f32[36,64], index: 0, kind: input, shape index: {}]   ;;  %s4515_s1 = inlined_call_operand.hbm [shape: f32[3,64,64], index: 1, kind: input, shape index: {}]   ;;  %s4516_s2 = inlined_call_operand.vmem [shape: f32[1,64], index: 2, kind: input, shape index: {}]   ;;  %s4517_s3 = inlined_call_operand.hbm [shape: f32[20,34], index: 3, kind: input, shape index: {}]   ;;  %s4518_s4 = inlined_call_operand.vmem [shape: f32[3,64,64], index: 4, kind: input, shape index: {}]   ;;  %s4519_s5 = inlined_call_operand.vmem [shape: f32[1,64], index: 5, kind: input, shape index: {}]   ;;  %s4520_s6 = inlined_call_operand.hbm [shape: f32[20,18], index: 6, kind: input, shape index: {}]   ;;  %s4521_s7 = inlined_call_operand.vmem [shape: f32[3,64,64], index: 7, kind: input, shape index: {}]   ;;  %s4522_s8 = inlined_call_operand.vmem [shape: f32[1,64], index: 8, kind: input, shape index: {}]   ;;  %s4523_s9 = inlined_call_operand.hbm [shape: f32[12,18], index: 9, kind: input, shape index: {}]   ;;  %s4524_s10 = inlined_call_operand.vmem [shape: f32[3,64,64], index: 10, kind: input, shape index: {}]   ;;  %s4525_s11 = inlined_call_operand.vmem [shape: f32[1,64], index: 11, kind: input, shape index: {}]   ;;  %s4526_s12 = inlined_call_operand.hbm [shape: f32[12,10], index: 12, kind: input, shape index: {}]   ;;  %s4527_s13 = inlined_call_operand.vmem [shape: f32[3,64,32], index: 13, kind: input, shape index: {}]   ;;  %s4528_s14 = inlined_call_operand.vmem [shape: f32[1,32], index: 14, kind: input, shape index: {}]   ;;  %s4529_s15 = inlined_call_operand.vmem [shape: f32[2,2,10], index: 15, kind: input, shape index: {}]   ;;  %s4530_s16 = inlined_call_operand.vmem [shape: f32[2,32,32], index: 16, kind: input, shape index: {}]   ;;  %s4531_s17 = inlined_call_operand.vmem [shape: f32[1,32], index: 17, kind: input, shape index: {}]   ;;  %s4532_s18 = inlined_call_operand.hbm [shape: f32[2,32], index: 18, kind: output, shape index: {}]  }
   0x1   :  { %4536 = sst [smem:[#allocation20_spill]] %s4514_s0 }
   0x2   :  { %4537 = sst [smem:[#allocation21_spill]] %s4515_s1 }
   0x3   :  { %4538 = sst [smem:[#allocation22_spill]] %s4516_s2 }
   0x4   :  { %4539 = sst [smem:[#allocation23_spill]] %s4532_s18 }
   0x5   :  { %23 = vsyncpa [#allocation7], 0 }
   0x6   :  { %24 = vsyncpa [#allocation10], 0 }
   0x7   :  { %25 = vsyncpa [#allocation13], 0 }
   0x8   :  { %26 = vsyncpa [#allocation8], 0  ;;  %s3711_s27 = smov [#allocation9]   ;;  %s3712_s29 = smov [#allocation12]  }
   0x9   :  { %s48_s28 = sshll.u32 %s3711_s27, 4  ;;  %s80_s30 = sshll.u32 %s3712_s29, 4  ;;  %s49_s28 = int_to_ptr.vmem [resolvable:$true] %s48_s28  ;;  %s3818_s30 = int_to_ptr.vmem [resolvable:$true] %s80_s30 }
   0xa   :  { %s3571_s1 = scalar_lea.hbm %s4517_s3, 384 }
   0xb   :  { %p3572_p0 = scmp.ne.s32.totalorder %s4517_s3, %s3571_s1  ;;  %p3575_p1 = scmp.lt.u32.totalorder %s3571_s1, %s4517_s3 }
   0xd   :  { %p3577_p2 = pnand %p3575_p1, %p3572_p0 }
   0xf   :  { %3580 = shalt.err (!%p3577_p2)
}
  0x10   :  { %s3581_s23 = scalar_lea.vmem %s49_s28, 384  ;;  %p3586_p4 = scmp.lt.s32.totalorder %s49_s28, %s49_s28 }
  0x11   :  { %p3582_p3 = scmp.ne.s32.totalorder %s49_s28, %s3581_s23  ;;  %p3587_p5 = scmp.lt.s32.totalorder %s3581_s23, %s3581_s23 }
  0x13   :  { %p3588_p6 = por %p3587_p5, %p3586_p4 }
  0x15   :  { %p3589_p7 = pnand %p3588_p6, %p3582_p3 }
  0x17   :  { %3592 = shalt.err (!%p3589_p7)
}
  0x18   :  { %s3713_s24 = smov 128   ;;  %s3714_s25 = smov 8  }
  0x19   :  { %54 = dma.hbm_to_vmem [thread:$0]  %s4517_s3, 384, %s49_s28, [#allocation10], %s3713_s24, %s3713_s24, %s3714_s25  }
  0x1a   :  { %s3593_s19 = scalar_lea.hbm %s4523_s9, 256 }
  0x1b   :  { %p3594_p8 = scmp.ne.s32.totalorder %s4523_s9, %s3593_s19  ;;  %p3597_p9 = scmp.lt.u32.totalorder %s3593_s19, %s4523_s9 }
  0x1d   :  { %p3599_p10 = pnand %p3597_p9, %p3594_p8 }
  0x1f   :  { %3602 = shalt.err (!%p3599_p10)
}
  0x20   :  { %s3603_s2 = scalar_lea.vmem %s3818_s30, 256  ;;  %p3608_p12 = scmp.lt.s32.totalorder %s3818_s30, %s3818_s30 }
  0x21   :  { %p3604_p11 = scmp.ne.s32.totalorder %s3818_s30, %s3603_s2  ;;  %p3609_p13 = scmp.lt.s32.totalorder %s3603_s2, %s3603_s2 }
  0x23   :  { %p3610_p0 = por %p3609_p13, %p3608_p12 }
  0x25   :  { %p3611_p1 = pnand %p3610_p0, %p3604_p11 }
  0x27   :  { %3614 = shalt.err (!%p3611_p1)
}
  0x28   :  { %86 = dma.hbm_to_vmem [thread:$0]  %s4523_s9, 256, %s3818_s30, [#allocation13], %s3713_s24, %s3713_s24, %s3714_s25  }
  0x29   :  { %s3715_s23 = smov [#allocation6]   ;;  %s3716_s27 = smov [#allocation11]  }
  0x2a   :  { %s34_s26 = sshll.u32 %s3715_s23, 4  ;;  %s64_s29 = sshll.u32 %s3716_s27, 4  ;;  %s35_s26 = int_to_ptr.vmem [resolvable:$true] %s34_s26  ;;  %s3855_s29 = int_to_ptr.vmem [resolvable:$true] %s64_s29 }
  0x2b   :  { %s4540_s1 = sld [smem:[#allocation21_spill]] }
  0x31   :  { %s3615_s20 = scalar_lea.hbm %s4540_s1, 3072 }
  0x32   :  { %p3616_p2 = scmp.ne.s32.totalorder %s4540_s1, %s3615_s20  ;;  %p3619_p3 = scmp.lt.u32.totalorder %s3615_s20, %s4540_s1 }
  0x34   :  { %p3621_p4 = pnand %p3619_p3, %p3616_p2 }
  0x36   :  { %3624 = shalt.err (!%p3621_p4)
}
  0x37   :  { %s3625_s9 = scalar_lea.vmem %s35_s26, 3072  ;;  %p3630_p6 = scmp.lt.s32.totalorder %s35_s26, %s35_s26 }
  0x38   :  { %p3626_p5 = scmp.ne.s32.totalorder %s35_s26, %s3625_s9  ;;  %p3631_p7 = scmp.lt.s32.totalorder %s3625_s9, %s3625_s9 }
  0x3a   :  { %p3632_p8 = por %p3631_p7, %p3630_p6 }
  0x3c   :  { %p3633_p9 = pnand %p3632_p8, %p3626_p5 }
  0x3e   :  { %3636 = shalt.err (!%p3633_p9)
}
  0x3f   :  { %40 = dma.hbm_to_vmem [thread:$0]  %s4540_s1, 3072, %s35_s26, [#allocation7], %s3713_s24, %s3713_s24, %s3714_s25  }
  0x40   :  { %s3637_s18 = scalar_lea.hbm %s4520_s6, 384 }
  0x41   :  { %p3638_p10 = scmp.ne.s32.totalorder %s4520_s6, %s3637_s18  ;;  %p3641_p11 = scmp.lt.u32.totalorder %s3637_s18, %s4520_s6 }
  0x43   :  { %p3643_p12 = pnand %p3641_p11, %p3638_p10 }
  0x45   :  { %3646 = shalt.err (!%p3643_p12)
}
  0x46   :  { %s3647_s21 = scalar_lea.vmem %s3855_s29, 384  ;;  %p3652_p0 = scmp.lt.s32.totalorder %s3855_s29, %s3855_s29 }
  0x47   :  { %p3648_p13 = scmp.ne.s32.totalorder %s3855_s29, %s3647_s21  ;;  %p3653_p1 = scmp.lt.s32.totalorder %s3647_s21, %s3647_s21 }
  0x49   :  { %p3654_p2 = por %p3653_p1, %p3652_p0 }
  0x4b   :  { %p3655_p3 = pnand %p3654_p2, %p3648_p13 }
  0x4d   :  { %3658 = shalt.err (!%p3655_p3)
}
  0x4e   :  { %70 = dma.hbm_to_vmem [thread:$0]  %s4520_s6, 384, %s3855_s29, [#allocation10], %s3713_s24, %s3713_s24, %s3714_s25  }
  0x4f   :  { %s3717_s22 = smov [#allocation14]   ;;  %s3659_s3 = scalar_lea.hbm %s4526_s12, 256 }
  0x50   :  { %s96_s2 = sshll.u32 %s3717_s22, 4  ;;  %p3660_p4 = scmp.ne.s32.totalorder %s4526_s12, %s3659_s3  ;;  %s97_s2 = int_to_ptr.vmem [resolvable:$true] %s96_s2 }
  0x51   :  { %p3663_p5 = scmp.lt.u32.totalorder %s3659_s3, %s4526_s12 }
  0x53   :  { %p3665_p6 = pnand %p3663_p5, %p3660_p4 }
  0x55   :  { %3668 = shalt.err (!%p3665_p6)
}
  0x56   :  { %s3669_s0 = scalar_lea.vmem %s97_s2, 256  ;;  %p3674_p8 = scmp.lt.s32.totalorder %s97_s2, %s97_s2 }
  0x57   :  { %p3670_p7 = scmp.ne.s32.totalorder %s97_s2, %s3669_s0  ;;  %p3675_p9 = scmp.lt.s32.totalorder %s3669_s0, %s3669_s0 }
  0x59   :  { %p3676_p10 = por %p3675_p9, %p3674_p8 }
  0x5b   :  { %p3677_p11 = pnand %p3676_p10, %p3670_p7 }
  0x5d   :  { %3680 = shalt.err (!%p3677_p11)
}
  0x5e   :  { %102 = dma.hbm_to_vmem [thread:$0]  %s4526_s12, 256, %s97_s2, [#allocation13], %s3713_s24, %s3713_s24, %s3714_s25  }
  0x5f   :  { %3703 = dma.done.wait [#allocation7], 3072  }
  0x60   :  { %3704 = vsyncadd [#allocation7], 4294964224 }
  0x61   :  { %3705 = dma.done.wait [#allocation10], 768  }
  0x62   :  { %3706 = vsyncadd [#allocation10], 4294966528 }
  0x63   :  { %3707 = dma.done.wait [#allocation13], 512  }
  0x64   :  { %3708 = vsyncadd [#allocation13], 4294966784  ;;  %v3718_v0 = vmov 0.0|0.0   ;;  %vm3719_vm0 = vmmov 0   ;;  %v3720_v1 = vmov 0.0   ;;  %v150_v2 = vld [vmem:[#allocation6 + $0x40] sm:$0xff] }
  0x65   :  { %3278 = vmatprep.subr.bf16.mxu0 %v3718_v0  ;;  %3290 = vmatprep.subr.bf16.mxu1 %v3718_v0  ;;  %v151_v3 = vld [vmem:[#allocation6 + $0x48] sm:$0xff]  ;;  %v136_v4 = vld [vmem:[#allocation6] sm:$0xff]  ;;  %v152_v7 = vld [vmem:[#allocation6 + $0x50] sm:$0xff]  ;;  %s4541_s25 = sld [smem:[#allocation20_spill]]  ;;  %vm158_vm1 = vcmask 523264   ;;  %s4542_s24 = sld [smem:[#allocation22_spill]] }
  0x66   :  { %2851 = vmatprep.mubr.msk.f32.mxu0 %vm3719_vm0, %v3720_v1  ;;  %2882 = vmatprep.mubr.msk.f32.mxu1 %vm3719_vm0, %v3720_v1  ;;  %v3279_v5 = vpack.c.bf16 %v151_v3, %v150_v2  ;;  %v137_v6 = vld [vmem:[#allocation6 + $0x8] sm:$0xff]  ;;  %v153_v8 = vld [vmem:[#allocation6 + $0x58] sm:$0xff]  ;;  %v138_v10 = vld [vmem:[#allocation6 + $0x10] sm:$0xff]  ;;  %vm540_vm2 = vcmask 1041408   ;;  %vm530_vm3 = vcmask 277504   ;;  %vm626_vm4 = vcmask 519168  }
  0x67   :  { %v3291_v9 = vpack.c.bf16 %v137_v6, %v136_v4  ;;  %v139_v11 = vld [vmem:[#allocation6 + $0x18] sm:$0xff]  ;;  %v3282_v12 = vpack.c.bf16 %v153_v8, %v152_v7  ;;  %v154_v14 = vld [vmem:[#allocation6 + $0x60] sm:$0xff]  ;;  %v155_v15 = vld [vmem:[#allocation6 + $0x68] sm:$0xff]  ;;  %vm961_vm5 = vcmask 146432   ;;  %vm1773_vm6 = vcmask 80896  }
  0x68   :  { %3280 = vmatpush3.bf16.msra.mxu0 %v3279_v5  ;;  %v3294_v13 = vpack.c.bf16 %v139_v11, %v138_v10  ;;  %v140_v16 = vld [vmem:[#allocation6 + $0x20] sm:$0xff]  ;;  %v141_v17 = vld [vmem:[#allocation6 + $0x28] sm:$0xff]  ;;  %v3285_v18 = vpack.c.bf16 %v155_v15, %v154_v14  ;;  %v156_v20 = vld [vmem:[#allocation6 + $0x70] sm:$0xff]  ;;  %vm3721_vm7 = vmmov 1   ;;  %vm2317_vm9 = vcmask 261120  }
  0x69   :  { %3292 = vmatpush3.bf16.msra.mxu1 %v3291_v9  ;;  %3281 = vmatprep.subr.bf16.mxu0 %v3718_v0  ;;  %v3297_v19 = vpack.c.bf16 %v141_v17, %v140_v16  ;;  %v157_v21 = vld [vmem:[#allocation6 + $0x78] sm:$0xff]  ;;  %v142_v22 = vld [vmem:[#allocation6 + $0x30] sm:$0xff]  ;;  %v375_v26 = vld [vmem:[#allocation6 + $0x80] sm:$0xff]  ;;  %vm2472_vm10 = vcmask 254976  }
  0x6a   :  { %3293 = vmatprep.subr.bf16.mxu1 %v3718_v0  ;;  %v143_v23 = vld [vmem:[#allocation6 + $0x38] sm:$0xff]  ;;  %v3288_v24 = vpack.c.bf16 %v157_v21, %v156_v20  ;;  %v376_v27 = vld [vmem:[#allocation6 + $0x88] sm:$0xff]  ;;  %v377_v31 = vld [vmem:[#allocation6 + $0x90] sm:$0xff] }
  0x6b   :  { %v3300_v25 = vpack.c.bf16 %v143_v23, %v142_v22  ;;  %v144_v28 = vld [vmem:[%s4541_s25 + $0x1] sm:$0xff]  ;;  %v3303_v30 = vpack.c.bf16 %v376_v27, %v375_v26  ;;  %v145_v33 = vld [vmem:[%s4541_s25 + $0x9] sm:$0xff]  ;;  %v380_v37 = vld [vmem:[#allocation6 + $0xa8] sm:$0xff] }
  0x6c   :  { %3283 = vmatpush3.bf16.msra.mxu0 %v3282_v12  ;;  %v131_v29 = vld [vmem:[%s4541_s25] sm:$0xff]  ;;  %v378_v32 = vld [vmem:[#allocation6 + $0x98] sm:$0xff]  ;;  %v379_v36 = vld [vmem:[#allocation6 + $0xa0] sm:$0xff] }
  0x6d   :  { %3295 = vmatpush3.bf16.msra.mxu1 %v3294_v13  ;;  %3284 = vmatprep.subr.bf16.mxu0 %v3718_v0  ;;  %v132_v34 = vld [vmem:[%s4541_s25 + $0x8] sm:$0xff]  ;;  %v3306_v35 = vpack.c.bf16 %v378_v32, %v377_v31  ;;  %v146_v38 = vld [vmem:[%s4541_s25 + $0x11] sm:$0xff]  ;;  %v3309_v40 = vpack.c.bf16 %v380_v37, %v379_v36  ;;  %v381_v41 = vld [vmem:[#allocation6 + $0xb0] sm:$0xff] }
  0x6e   :  { %3296 = vmatprep.subr.bf16.mxu1 %v3718_v0  ;;  %v133_v39 = vld [vmem:[%s4541_s25 + $0x10] sm:$0xff]  ;;  %v382_v42 = vld [vmem:[#allocation6 + $0xb8] sm:$0xff]  ;;  %v147_v43 = vld [vmem:[%s4541_s25 + $0x19] sm:$0xff] }
  0x6f   :  { %v134_v44 = vld [vmem:[%s4541_s25 + $0x18] sm:$0xff]  ;;  %v3312_v45 = vpack.c.bf16 %v382_v42, %v381_v41  ;;  %v148_v46 = vld [vmem:[%s4541_s25 + $0x21] sm:$0x3]  ;;  %v370_v49 = vld [vmem:[%s4541_s25 + $0xa] sm:$0xff] }
  0x70   :  { %3286 = vmatpush3.bf16.msra.mxu0 %v3285_v18  ;;  %v135_v47 = vld [vmem:[%s4541_s25 + $0x20] sm:$0x3]  ;;  %v369_v48 = vld [vmem:[%s4541_s25 + $0x2] sm:$0xff]  ;;  %v371_v50 = vld [vmem:[%s4541_s25 + $0x12] sm:$0xff] }
  0x71   :  { %3298 = vmatpush3.bf16.msra.mxu1 %v3297_v19  ;;  %3287 = vmatprep.subr.bf16.mxu0 %v3718_v0  ;;  %v372_v51 = vld [vmem:[%s4541_s25 + $0x1a] sm:$0xff]  ;;  %v373_v52 = vld [vmem:[%s4541_s25 + $0x22] sm:$0x3]  ;;  %v635_v54 = vld [vmem:[%s4518_s4 + $0x8] sm:$0xff] }
  0x72   :  { %3299 = vmatprep.subr.bf16.mxu1 %v3718_v0  ;;  %v634_v53 = vld [vmem:[%s4518_s4] sm:$0xff]  ;;  %v636_v56 = vld [vmem:[%s4518_s4 + $0x10] sm:$0xff]  ;;  %v637_v57 = vld [vmem:[%s4518_s4 + $0x18] sm:$0xff] }
  0x73   :  { %v3333_v55 = vpack.c.bf16 %v635_v54, %v634_v53  ;;  %v3336_v58 = vpack.c.bf16 %v637_v57, %v636_v56  ;;  %v2506_v23 = vld [vmem:[%s4542_s24] ss:$0 sm:$0xff]  ;;  %vm4369_vm8 = vmpackc.low %vm540_vm2, %vm3721_vm7 }
  0x74   :  { %3289 = vmatpush3.bf16.msra.mxu0 %v3288_v24 }
  0x75   :  { %3301 = vmatpush3.bf16.msra.mxu1 %v3300_v25  ;;  %3302 = vmatprep.subr.bf16.mxu0 %v3718_v0 }
  0x76   :  { %3314 = vmatprep.subr.bf16.mxu1 %v3718_v0 }
  0x77   :  { %2852 = vmatmul.mubr.msk.f32.vlgmr.msra.gmra.mrb[0].mxu0 %vm158_vm1, %v144_v28 }
  0x78   :  { %2883 = vmatmul.mubr.msk.f32.vlgmr.msra.gmra.mrb[0].mxu1 %vm158_vm1, %v131_v29  ;;  %2854 = vmatprep.mubr.msk.f32.mxu0 %vm3719_vm0, %v3720_v1 }
  0x79   :  { %2885 = vmatprep.mubr.msk.f32.mxu1 %vm3719_vm0, %v3720_v1  ;;  %3304 = vmatpush3.bf16.msra.mxu0 %v3303_v30 }
  0x7a   :  { %3305 = vmatprep.subr.bf16.mxu0 %v3718_v0 }
  0x7b   :  { %2855 = vmatmul.mubr.msk.f32.gmra.mrb[2].mxu0 %vm158_vm1, %v145_v33 }
  0x7c   :  { %2886 = vmatmul.mubr.msk.f32.gmra.mrb[2].mxu1 %vm158_vm1, %v132_v34  ;;  %2857 = vmatprep.mubr.msk.f32.mxu0 %vm3719_vm0, %v3720_v1 }
  0x7d   :  { %2888 = vmatprep.mubr.msk.f32.mxu1 %vm3719_vm0, %v3720_v1  ;;  %3307 = vmatpush3.bf16.msra.mxu0 %v3306_v35 }
  0x7e   :  { %3308 = vmatprep.subr.bf16.mxu0 %v3718_v0 }
  0x7f   :  { %2858 = vmatmul.mubr.msk.f32.gmra.mrb[4].mxu0 %vm158_vm1, %v146_v38 }
  0x80   :  { %2889 = vmatmul.mubr.msk.f32.gmra.mrb[4].mxu1 %vm158_vm1, %v133_v39  ;;  %2860 = vmatprep.mubr.msk.f32.mxu0 %vm3719_vm0, %v3720_v1 }
  0x81   :  { %2891 = vmatprep.mubr.msk.f32.mxu1 %vm3719_vm0, %v3720_v1  ;;  %3310 = vmatpush3.bf16.msra.mxu0 %v3309_v40 }
  0x82   :  { %3311 = vmatprep.subr.bf16.mxu0 %v3718_v0 }
  0x83   :  { %2861 = vmatmul.mubr.msk.f32.gmra.mrb[6].mxu0 %vm158_vm1, %v147_v43 }
  0x84   :  { %2892 = vmatmul.mubr.msk.f32.gmra.mrb[6].mxu1 %vm158_vm1, %v134_v44  ;;  %2863 = vmatprep.mubr.msk.f32.mxu0 %vm3719_vm0, %v3720_v1 }
  0x85   :  { %2894 = vmatprep.mubr.msk.f32.mxu1 %vm3719_vm0, %v3720_v1  ;;  %3313 = vmatpush3.bf16.msra.mxu0 %v3312_v45 }
  0x86   :  { %3332 = vmatprep.subr.bf16.mxu0 %v3718_v0 }
  0x87   :  { %2864 = vmatmul.mubr.msk.f32.gmra.mrb[8].mxu0 %vm158_vm1, %v148_v46 }
  0x88   :  { %2895 = vmatmul.mubr.msk.f32.gmra.mrb[8].mxu1 %vm158_vm1, %v135_v47  ;;  %2913 = vmatprep.mubr.msk.f32.mxu0 %vm3719_vm0, %v3720_v1 }
  0x89   :  { %2938 = vmatprep.mubr.msk.f32.mxu1 %vm3719_vm0, %v3720_v1 }
  0x8b   :  { %2914 = vmatmul.mubr.msk.f32.vlgmr.msra.gmra.mrb[10].mxu0 %vm158_vm1, %v369_v48 }
  0x8c   :  { %2916 = vmatprep.mubr.msk.f32.mxu0 %vm3719_vm0, %v3720_v1  ;;  %3334 = vmatpush3.bf16.msra.mxu0 %v3333_v55 }
  0x8d   :  { %3335 = vmatprep.subr.bf16.mxu0 %v3718_v0 }
  0x8f   :  { %2917 = vmatmul.mubr.msk.f32.gmra.mrb[12].mxu0 %vm158_vm1, %v370_v49 }
  0x90   :  { %2919 = vmatprep.mubr.msk.f32.mxu0 %vm3719_vm0, %v3720_v1  ;;  %3337 = vmatpush3.bf16.msra.mxu0 %v3336_v58 }
  0x91   :  { %3338 = vmatprep.subr.bf16.mxu0 %v3718_v0 }
  0x93   :  { %2920 = vmatmul.mubr.msk.f32.gmra.mrb[14].mxu0 %vm158_vm1, %v371_v50 }
  0x94   :  { %2922 = vmatprep.mubr.msk.f32.mxu0 %vm3719_vm0, %v3720_v1 }
  0x97   :  { %2923 = vmatmul.mubr.msk.f32.gmra.mrb[16].mxu0 %vm158_vm1, %v372_v51 }
  0x98   :  { %2925 = vmatprep.mubr.msk.f32.mxu0 %vm3719_vm0, %v3720_v1 }
  0x9b   :  { %2926 = vmatmul.mubr.msk.f32.gmra.mrb[18].mxu0 %vm158_vm1, %v373_v52 }
  0x9c   :  { %2988 = vmatprep.mubr.msk.f32.mxu0 %vm3719_vm0, %v3720_v1 }
 0x14a   :  { %v240_v59 = vpop.f32.mrb[0].mxu0 }
 0x14b   :  { %v345_v60 = vpop.f32.mrb[0].mxu1  ;;  %v2853_v61 = vpop.f32.mrb[1].mxu0 }
 0x14c   :  { %v346_v62 = vadd.f32 %v345_v60, %v240_v59  ;;  %v2884_v63 = vpop.f32.mrb[1].mxu1 }
 0x14e   :  { %v245_v2 = vpop.f32.mrb[2].mxu0 }
 0x14f   :  { %v350_v3 = vpop.f32.mrb[2].mxu1  ;;  %v2856_v4 = vpop.f32.mrb[3].mxu0 }
 0x150   :  { %v351_v5 = vadd.f32 %v350_v3, %v245_v2  ;;  %v2887_v6 = vpop.f32.mrb[3].mxu1 }
 0x151   :  { %v2511_v6 = vld [vmem:[%s4518_s4 + $0x40] sm:$0xff] }
 0x152   :  { %v250_v7 = vpop.f32.mrb[4].mxu0 }
 0x153   :  { %v355_v8 = vpop.f32.mrb[4].mxu1  ;;  %v2859_v9 = vpop.f32.mrb[5].mxu0 }
 0x154   :  { %v356_v10 = vadd.f32 %v355_v8, %v250_v7  ;;  %v2890_v11 = vpop.f32.mrb[5].mxu1  ;;  %v2512_v7 = vld [vmem:[%s4518_s4 + $0x48] sm:$0xff] }
 0x155   :  { %v3321_v11 = vpack.c.bf16 %v2512_v7, %v2511_v6 }
 0x156   :  { %v255_v12 = vpop.f32.mrb[6].mxu0 }
 0x157   :  { %v360_v13 = vpop.f32.mrb[6].mxu1  ;;  %v2862_v14 = vpop.f32.mrb[7].mxu0 }
 0x158   :  { %v361_v15 = vadd.f32 %v360_v13, %v255_v12  ;;  %v2893_v16 = vpop.f32.mrb[7].mxu1  ;;  %v129_v12 = vld [vmem:[#allocation9 + $0x8] sm:$0xff]  ;;  %v130_v13 = vld [vmem:[#allocation9 + $0x10] sm:$0xf]  ;;  %v2513_v14 = vld [vmem:[%s4518_s4 + $0x50] sm:$0xff] }
 0x15a   :  { %v260_v17 = vpop.f32.mrb[8].mxu0 }
 0x15b   :  { %v365_v18 = vpop.f32.mrb[8].mxu1  ;;  %v2865_v19 = vpop.f32.mrb[9].mxu0 }
 0x15c   :  { %v366_v20 = vadd.f32 %v365_v18, %v260_v17  ;;  %v2896_v21 = vpop.f32.mrb[9].mxu1  ;;  %v638_v17 = vld [vmem:[%s4518_s4 + $0x20] sm:$0xff]  ;;  %v639_v18 = vld [vmem:[%s4518_s4 + $0x28] sm:$0xff] }
 0x15d   :  { %v3339_v19 = vpack.c.bf16 %v639_v18, %v638_v17  ;;  %v2516_v21 = vld [vmem:[%s4518_s4 + $0x68] sm:$0xff] }
 0x15e   :  { %v464_v22 = vpop.f32.mrb[10].mxu0 }
 0x15f   :  { %v488_v24 = vadd.f32 %v464_v22, %v346_v62  ;;  %v2915_v25 = vpop.f32.mrb[11].mxu0  ;;  %3340 = vmatpush3.bf16.msra.mxu0 %v3339_v19 }
 0x160   :  { %3341 = vmatprep.subr.bf16.mxu0 %v3718_v0 }
 0x161   :  { %v500_v26 = vadd.f32 %v2506_v23, %v488_v24  ;;  %v641_v24 = vld [vmem:[%s4518_s4 + $0x38] sm:$0xff] }
 0x162   :  { %v469_v27 = vpop.f32.mrb[12].mxu0 }
 0x163   :  { %v510_v28 = vmul.f32 0.70710677, %v500_v26  ;;  %v489_v29 = vadd.f32 %v469_v27, %v351_v5  ;;  %v2918_v30 = vpop.f32.mrb[13].mxu0  ;;  %v505_v51 = vmul.f32 0.5, %v500_v26  ;;  %v2517_v26 = vld [vmem:[%s4518_s4 + $0x70] sm:$0xff]  ;;  %v2518_v27 = vld [vmem:[%s4518_s4 + $0x78] sm:$0xff] }
 0x165   :  { %3541 = verf.f32 %v510_v28  ;;  %v501_v31 = vadd.f32 %v2506_v23, %v489_v29  ;;  %v3330_v28 = vpack.c.bf16 %v2518_v27, %v2517_v26 }
 0x166   :  { %v474_v32 = vpop.f32.mrb[14].mxu0 }
 0x167   :  { %v511_v33 = vmul.f32 0.70710677, %v501_v31  ;;  %v490_v34 = vadd.f32 %v474_v32, %v356_v10  ;;  %v2921_v35 = vpop.f32.mrb[15].mxu0  ;;  %v506_v52 = vmul.f32 0.5, %v501_v31  ;;  %v128_v10 = vld [vmem:[#allocation9] sm:$0xff] }
 0x169   :  { %3543 = verf.f32 %v511_v33  ;;  %v502_v36 = vadd.f32 %v2506_v23, %v490_v34  ;;  %v2525_v33 = vld [vmem:[%s4518_s4 + $0x80] sm:$0xff]  ;;  %v2526_v34 = vld [vmem:[%s4518_s4 + $0x88] sm:$0xff] }
 0x16a   :  { %v479_v37 = vpop.f32.mrb[16].mxu0 }
 0x16b   :  { %v512_v38 = vmul.f32 0.70710677, %v502_v36  ;;  %v491_v39 = vadd.f32 %v479_v37, %v361_v15  ;;  %v2924_v40 = vpop.f32.mrb[17].mxu0  ;;  %v507_v60 = vmul.f32 0.5, %v502_v36  ;;  %v2514_v15 = vld [vmem:[%s4518_s4 + $0x58] sm:$0xff] }
 0x16c   :  { %v3324_v16 = vpack.c.bf16 %v2514_v15, %v2513_v14  ;;  %v2528_v40 = vld [vmem:[%s4518_s4 + $0x98] sm:$0xff] }
 0x16d   :  { %3545 = verf.f32 %v512_v38  ;;  %v503_v41 = vadd.f32 %v2506_v23, %v491_v39  ;;  %v3345_v38 = vpack.c.bf16 %v2526_v34, %v2525_v33  ;;  %v2527_v39 = vld [vmem:[%s4518_s4 + $0x90] sm:$0xff] }
 0x16e   :  { %v484_v42 = vpop.f32.mrb[18].mxu0 }
 0x16f   :  { %v3542_v43 = vpop.eup %3541  ;;  %v513_v44 = vmul.f32 0.70710677, %v503_v41  ;;  %v492_v45 = vadd.f32 %v484_v42, %v366_v20  ;;  %v2927_v46 = vpop.f32.mrb[19].mxu0  ;;  %v508_v61 = vmul.f32 0.5, %v503_v41  ;;  %v2515_v20 = vld [vmem:[%s4518_s4 + $0x60] sm:$0xff] }
 0x170   :  { %v520_v48 = vadd.f32 1.0, %v3542_v43  ;;  %v3327_v22 = vpack.c.bf16 %v2516_v21, %v2515_v20  ;;  %v3348_v43 = vpack.c.bf16 %v2528_v40, %v2527_v39 }
 0x171   :  { %3547 = verf.f32 %v513_v44  ;;  %v504_v47 = vadd.f32 %v2506_v23, %v492_v45  ;;  %v640_v23 = vld [vmem:[%s4518_s4 + $0x30] sm:$0xff]  ;;  %v2529_v44 = vld [vmem:[%s4518_s4 + $0xa0] sm:$0xff]  ;;  %v2530_v45 = vld [vmem:[%s4518_s4 + $0xa8] sm:$0xff] }
 0x172   :  { %v525_v54 = vmul.f32 %v520_v48, %v505_v51  ;;  %v3342_v25 = vpack.c.bf16 %v641_v24, %v640_v23  ;;  %v2532_v51 = vld [vmem:[%s4518_s4 + $0xb8] sm:$0xff] }
 0x173   :  { %v3544_v49 = vpop.eup %3543  ;;  %v514_v50 = vmul.f32 0.70710677, %v504_v47  ;;  %v509_v8 = vmul.f32 0.5, %v504_v47 }
 0x174   :  { %v521_v53 = vadd.f32 1.0, %v3544_v49  ;;  %3343 = vmatpush3.bf16.msra.mxu0 %v3342_v25  ;;  %v3351_v49 = vpack.c.bf16 %v2530_v45, %v2529_v44 }
 0x175   :  { %3549 = verf.f32 %v514_v50  ;;  %3356 = vmatprep.subr.bf16.mxu0 %v3718_v0  ;;  %v2531_v50 = vld [vmem:[%s4518_s4 + $0xb0] sm:$0xff]  ;;  %s3722_s4 = smov [#allocation15]  }
 0x176   :  { %v526_v55 = vmul.f32 %v521_v53, %v506_v52  ;;  %v3354_v52 = vpack.c.bf16 %v2532_v51, %v2531_v50  ;;  %v2543_v50 = vld [vmem:[%s4521_s7 + $0x50] sm:$0xff]  ;;  %v2544_v51 = vld [vmem:[%s4521_s7 + $0x58] sm:$0xff]  ;;  %s2480_s19 = sshll.u32 %s3722_s4, 4  ;;  %s2481_s19 = int_to_ptr.vmem [resolvable:$true] %s2480_s19 }
 0x177   :  { %v3546_v56 = vpop.eup %3545  ;;  %s3681_s20 = scalar_lea.vmem %s2481_s19, 32  ;;  %p3686_p13 = scmp.lt.s32.totalorder %s2481_s19, %s2481_s19 }
 0x178   :  { %v3315_v57 = vpack.c.bf16 %v526_v55, %v525_v54  ;;  %v522_v58 = vadd.f32 1.0, %v3546_v56  ;;  %v1062_v56 = vld [vmem:[%s4521_s7] sm:$0xff]  ;;  %p3682_p12 = scmp.ne.s32.totalorder %s2481_s19, %s3681_s20  ;;  %p3687_p0 = scmp.lt.s32.totalorder %s3681_s20, %s3681_s20 }
 0x17a   :  { %3316 = vmatpush3.bf16.msra.mxu1 %v3315_v57  ;;  %v527_v63 = vmul.f32 %v522_v58, %v507_v60  ;;  %v1063_v57 = vld [vmem:[%s4521_s7 + $0x8] sm:$0xff]  ;;  %v1065_v60 = vld [vmem:[%s4521_s7 + $0x18] sm:$0xff]  ;;  %p3688_p1 = por %p3687_p0, %p3686_p13 }
 0x17b   :  { %v3548_v59 = vpop.eup %3547  ;;  %3317 = vmatprep.subr.bf16.mxu1 %v3718_v0  ;;  %v3372_v58 = vpack.c.bf16 %v1063_v57, %v1062_v56  ;;  %v2545_v56 = vld [vmem:[%s4521_s7 + $0x60] sm:$0xff]  ;;  %v2546_v57 = vld [vmem:[%s4521_s7 + $0x68] sm:$0xff] }
 0x17c   :  { %v523_v62 = vadd.f32 1.0, %v3548_v59  ;;  %v1064_v59 = vld [vmem:[%s4521_s7 + $0x10] sm:$0xff]  ;;  %p3689_p2 = pnand %p3688_p1, %p3682_p12 }
 0x17e   :  { %v528_v2 = vmul.f32 %v523_v62, %v508_v61  ;;  %v3375_v61 = vpack.c.bf16 %v1065_v60, %v1064_v59  ;;  %v1068_v59 = vld [vmem:[%s4521_s7 + $0x30] sm:$0xff]  ;;  %v1069_v60 = vld [vmem:[%s4521_s7 + $0x38] sm:$0xff] }
 0x17f   :  { %v3550_v3 = vpop.eup %3549 }
 0x180   :  { %v524_v4 = vadd.f32 1.0, %v3550_v3  ;;  %v3318_v5 = vpack.c.bf16 %v528_v2, %v527_v63 }
 0x182   :  { %3319 = vmatpush3.bf16.msra.mxu1 %v3318_v5  ;;  %v529_v9 = vmul.f32 %v524_v4, %v509_v8 }
 0x183   :  { %2936 = vmatprep.subr.mxu1 %v3720_v1 }
 0x186   :  { %2937 = vmatpush3.msk.msra.mxu1 %vm540_vm2, %v529_v9 }
 0x187   :  { %2939 = vmatmul.mubr.msk.f32.vlgmr.msra.gmra.mrb[10].mxu1 %vm530_vm3, %v128_v10  ;;  %3320 = vmatprep.subr.bf16.mxu1 %v3718_v0 }
 0x188   :  { %2941 = vmatprep.mubr.msk.f32.mxu1 %vm3719_vm0, %v3720_v1  ;;  %3322 = vmatpush3.bf16.msra.mxu1 %v3321_v11 }
 0x189   :  { %3323 = vmatprep.subr.bf16.mxu1 %v3718_v0 }
 0x18b   :  { %2942 = vmatmul.mubr.msk.f32.gmra.mrb[12].mxu1 %vm530_vm3, %v129_v12 }
 0x18c   :  { %2944 = vmatprep.mubr.msk.f32.mxu1 %vm3719_vm0, %v3720_v1  ;;  %3325 = vmatpush3.bf16.msra.mxu1 %v3324_v16  ;;  %v2536_v16 = vld [vmem:[%s4519_s5] ss:$0 sm:$0xff] }
 0x18d   :  { %3326 = vmatprep.subr.bf16.mxu1 %v3718_v0 }
 0x18f   :  { %2945 = vmatmul.mubr.msk.f32.gmra.mrb[14].mxu1 %vm530_vm3, %v130_v13 }
 0x190   :  { %2963 = vmatprep.mubr.msk.f32.mxu1 %vm3719_vm0, %v3720_v1  ;;  %3328 = vmatpush3.bf16.msra.mxu1 %v3327_v22 }
 0x191   :  { %3329 = vmatprep.subr.bf16.mxu1 %v3718_v0 }
 0x194   :  { %3331 = vmatpush3.bf16.msra.mxu1 %v3330_v28 }
 0x195   :  { %3344 = vmatprep.subr.bf16.mxu1 %v3718_v0 }
 0x25a   :  { %v610_v29 = vpop.f32.mrb[10].mxu1 }
 0x25b   :  { %624 = vst.msk [vmem:[#allocation2] sm:$0xff] %vm158_vm1, %v610_v29  ;;  %v2940_v30 = vpop.f32.mrb[11].mxu1 }
 0x25e   :  { %v615_v31 = vpop.f32.mrb[12].mxu1 }
 0x25f   :  { %625 = vst.msk [vmem:[#allocation2 + $0x8] sm:$0xff] %vm158_vm1, %v615_v31  ;;  %v2943_v32 = vpop.f32.mrb[13].mxu1 }
 0x262   :  { %v620_v35 = vpop.f32.mrb[14].mxu1  ;;  %v631_v36 = vld [vmem:[#allocation2] sm:$0xff] }
 0x263   :  { %627 = vst.msk [vmem:[#allocation2 + $0x10] sm:$0xf] %vm626_vm4, %v620_v35  ;;  %2989 = vmatmul.mubr.msk.f32.vlgmr.msra.gmra.mrb[20].mxu0 %vm158_vm1, %v631_v36  ;;  %v2946_v37 = vpop.f32.mrb[15].mxu1 }
 0x264   :  { %2991 = vmatprep.mubr.msk.f32.mxu0 %vm3719_vm0, %v3720_v1 }
 0x266   :  { %v642_v41 = vld [vmem:[#allocation2 + $0x1] sm:$0xff] }
 0x267   :  { %v632_v42 = vld [vmem:[#allocation2 + $0x8] sm:$0xff]  ;;  %2964 = vmatmul.mubr.msk.f32.vlgmr.msra.gmra.mrb[16].mxu1 %vm158_vm1, %v642_v41 }
 0x268   :  { %2992 = vmatmul.mubr.msk.f32.gmra.mrb[22].mxu0 %vm158_vm1, %v632_v42  ;;  %3346 = vmatpush3.bf16.msra.mxu1 %v3345_v38  ;;  %v832_v53 = vld [vmem:[#allocation2 + $0x2] sm:$0xff] }
 0x269   :  { %2966 = vmatprep.mubr.msk.f32.mxu1 %vm3719_vm0, %v3720_v1  ;;  %3347 = vmatprep.subr.bf16.mxu1 %v3718_v0  ;;  %v2541_v42 = vld [vmem:[%s4521_s7 + $0x40] sm:$0xff] }
 0x26a   :  { %2994 = vmatprep.mubr.msk.f32.mxu0 %vm3719_vm0, %v3720_v1  ;;  %v643_v46 = vld [vmem:[#allocation2 + $0x9] sm:$0xff]  ;;  %v644_v48 = vld [vmem:[#allocation2 + $0x11] sm:$0x3] }
 0x26b   :  { %v633_v47 = vld [vmem:[#allocation2 + $0x10] sm:$0x3]  ;;  %2967 = vmatmul.mubr.msk.f32.gmra.mrb[18].mxu1 %vm158_vm1, %v643_v46  ;;  %v834_v55 = vld [vmem:[#allocation2 + $0x12] sm:$0x3]  ;;  %v628_v46 = vld [vmem:[#allocation11] sm:$0xff] }
 0x26c   :  { %2995 = vmatmul.mubr.msk.f32.gmra.mrb[24].mxu0 %vm158_vm1, %v633_v47  ;;  %3349 = vmatpush3.bf16.msra.mxu1 %v3348_v43  ;;  %v833_v54 = vld [vmem:[#allocation2 + $0xa] sm:$0xff] }
 0x26d   :  { %2969 = vmatprep.mubr.msk.f32.mxu1 %vm3719_vm0, %v3720_v1  ;;  %3350 = vmatprep.subr.bf16.mxu1 %v3718_v0  ;;  %v2542_v43 = vld [vmem:[%s4521_s7 + $0x48] sm:$0xff] }
 0x26e   :  { %3028 = vmatprep.mubr.msk.f32.mxu0 %vm3719_vm0, %v3720_v1  ;;  %v3360_v47 = vpack.c.bf16 %v2542_v43, %v2541_v42 }
 0x26f   :  { %2970 = vmatmul.mubr.msk.f32.gmra.mrb[20].mxu1 %vm158_vm1, %v644_v48  ;;  %v629_v48 = vld [vmem:[#allocation11 + $0x8] sm:$0xff] }
 0x270   :  { %3352 = vmatpush3.bf16.msra.mxu1 %v3351_v49  ;;  %3013 = vmatprep.mubr.msk.f32.mxu1 %vm3719_vm0, %v3720_v1  ;;  %v630_v49 = vld [vmem:[#allocation11 + $0x10] sm:$0xf] }
 0x271   :  { %3353 = vmatprep.subr.bf16.mxu1 %v3718_v0 }
 0x274   :  { %3355 = vmatpush3.bf16.msra.mxu1 %v3354_v52  ;;  %v3363_v52 = vpack.c.bf16 %v2544_v51, %v2543_v50 }
 0x275   :  { %3371 = vmatprep.subr.bf16.mxu1 %v3718_v0 }
 0x277   :  { %3014 = vmatmul.mubr.msk.f32.vlgmr.msra.gmra.mrb[22].mxu1 %vm158_vm1, %v832_v53  ;;  %v1066_v53 = vld [vmem:[%s4521_s7 + $0x20] sm:$0xff] }
 0x278   :  { %3016 = vmatprep.mubr.msk.f32.mxu1 %vm3719_vm0, %v3720_v1  ;;  %3373 = vmatpush3.bf16.msra.mxu1 %v3372_v58  ;;  %v3366_v58 = vpack.c.bf16 %v2546_v57, %v2545_v56 }
 0x279   :  { %3374 = vmatprep.subr.bf16.mxu1 %v3718_v0 }
 0x27b   :  { %3017 = vmatmul.mubr.msk.f32.gmra.mrb[24].mxu1 %vm158_vm1, %v833_v54  ;;  %v1067_v54 = vld [vmem:[%s4521_s7 + $0x28] sm:$0xff] }
 0x27c   :  { %3019 = vmatprep.mubr.msk.f32.mxu1 %vm3719_vm0, %v3720_v1  ;;  %3376 = vmatpush3.bf16.msra.mxu1 %v3375_v61  ;;  %v3381_v61 = vpack.c.bf16 %v1069_v60, %v1068_v59 }
 0x27d   :  { %3377 = vmatprep.subr.bf16.mxu1 %v3718_v0 }
 0x27f   :  { %3020 = vmatmul.mubr.msk.f32.gmra.mrb[26].mxu1 %vm158_vm1, %v834_v55  ;;  %v3378_v55 = vpack.c.bf16 %v1067_v54, %v1066_v53 }
 0x280   :  { %3078 = vmatprep.mubr.msk.f32.mxu1 %vm3719_vm0, %v3720_v1 }
 0x281   :  { %3379 = vmatpush3.bf16.msra.mxu1 %v3378_v55 }
 0x282   :  { %3380 = vmatprep.subr.bf16.mxu1 %v3718_v0 }
 0x285   :  { %3382 = vmatpush3.bf16.msra.mxu1 %v3381_v61 }
 0x336   :  { %v818_v62 = vpop.f32.mrb[20].mxu0 }
 0x337   :  { %v2990_v63 = vpop.f32.mrb[21].mxu0 }
 0x338   :  { %v2548_v63 = vld [vmem:[%s4521_s7 + $0x78] sm:$0xff] }
 0x33a   :  { %v729_v2 = vpop.f32.mrb[16].mxu1 }
 0x33b   :  { %v823_v3 = vpop.f32.mrb[22].mxu0  ;;  %v819_v4 = vadd.f32 %v818_v62, %v729_v2  ;;  %v2965_v5 = vpop.f32.mrb[17].mxu1  ;;  %v2547_v62 = vld [vmem:[%s4521_s7 + $0x70] sm:$0xff] }
 0x33c   :  { %v2993_v6 = vpop.f32.mrb[23].mxu0  ;;  %v3369_v2 = vpack.c.bf16 %v2548_v63, %v2547_v62 }
 0x33e   :  { %v734_v7 = vpop.f32.mrb[18].mxu1 }
 0x33f   :  { %v828_v8 = vpop.f32.mrb[24].mxu0  ;;  %v824_v9 = vadd.f32 %v823_v3, %v734_v7  ;;  %v2968_v10 = vpop.f32.mrb[19].mxu1  ;;  %v2555_v7 = vld [vmem:[%s4521_s7 + $0x80] sm:$0xff] }
 0x340   :  { %v2996_v11 = vpop.f32.mrb[25].mxu0 }
 0x342   :  { %v739_v12 = vpop.f32.mrb[20].mxu1 }
 0x343   :  { %v829_v13 = vadd.f32 %v828_v8, %v739_v12  ;;  %v2971_v14 = vpop.f32.mrb[21].mxu1  ;;  %v2556_v8 = vld [vmem:[%s4521_s7 + $0x88] sm:$0xff] }
 0x344   :  { %v3384_v12 = vpack.c.bf16 %v2556_v8, %v2555_v7  ;;  %v2558_v14 = vld [vmem:[%s4521_s7 + $0x98] sm:$0xff] }
 0x34a   :  { %v919_v15 = vpop.f32.mrb[22].mxu1 }
 0x34b   :  { %v933_v17 = vadd.f32 %v919_v15, %v819_v4  ;;  %v3015_v18 = vpop.f32.mrb[23].mxu1 }
 0x34c   :  { %v2559_v18 = vld [vmem:[%s4521_s7 + $0xa0] sm:$0xff] }
 0x34d   :  { %v943_v19 = vadd.f32 %v2536_v16, %v933_v17 }
 0x34e   :  { %v924_v20 = vpop.f32.mrb[24].mxu1 }
 0x34f   :  { %v949_v21 = vmul.f32 0.70710677, %v943_v19  ;;  %v934_v22 = vadd.f32 %v924_v20, %v824_v9  ;;  %v3018_v23 = vpop.f32.mrb[25].mxu1  ;;  %v946_v34 = vmul.f32 0.5, %v943_v19  ;;  %v2560_v19 = vld [vmem:[%s4521_s7 + $0xa8] sm:$0xff] }
 0x350   :  { %v3390_v23 = vpack.c.bf16 %v2560_v19, %v2559_v18  ;;  %v1058_v18 = vld [vmem:[#allocation12 + $0x8] sm:$0xf] }
 0x351   :  { %3551 = verf.f32 %v949_v21  ;;  %v944_v24 = vadd.f32 %v2536_v16, %v934_v22 }
 0x352   :  { %v929_v25 = vpop.f32.mrb[26].mxu1 }
 0x353   :  { %v950_v26 = vmul.f32 0.70710677, %v944_v24  ;;  %v935_v27 = vadd.f32 %v929_v25, %v829_v13  ;;  %v3021_v28 = vpop.f32.mrb[27].mxu1  ;;  %v947_v35 = vmul.f32 0.5, %v944_v24  ;;  %v2557_v13 = vld [vmem:[%s4521_s7 + $0x90] sm:$0xff]  ;;  %v2562_v25 = vld [vmem:[%s4521_s7 + $0xb8] sm:$0xff] }
 0x354   :  { %v3387_v17 = vpack.c.bf16 %v2558_v14, %v2557_v13  ;;  %v2561_v24 = vld [vmem:[%s4521_s7 + $0xb0] sm:$0xff]  ;;  %v2571_v13 = vld [vmem:[%s4524_s10 + $0x48] sm:$0xff] }
 0x355   :  { %3553 = verf.f32 %v950_v26  ;;  %v945_v29 = vadd.f32 %v2536_v16, %v935_v27  ;;  %v3393_v26 = vpack.c.bf16 %v2562_v25, %v2561_v24  ;;  %v2577_v24 = vld [vmem:[%s4524_s10 + $0x78] sm:$0xff] }
 0x357   :  { %v951_v30 = vmul.f32 0.70710677, %v945_v29  ;;  %v948_v44 = vmul.f32 0.5, %v945_v29 }
 0x359   :  { %3555 = verf.f32 %v951_v30  ;;  %v1057_v30 = vld [vmem:[#allocation12] sm:$0xff] }
 0x35b   :  { %v3552_v31 = vpop.eup %3551 }
 0x35c   :  { %v955_v32 = vadd.f32 1.0, %v3552_v31 }
 0x35e   :  { %v958_v37 = vmul.f32 %v955_v32, %v946_v34 }
 0x35f   :  { %v3554_v33 = vpop.eup %3553 }
 0x360   :  { %v956_v36 = vadd.f32 1.0, %v3554_v33 }
 0x362   :  { %v959_v38 = vmul.f32 %v956_v36, %v947_v35 }
 0x363   :  { %v3556_v39 = vpop.eup %3555 }
 0x364   :  { %v957_v40 = vadd.f32 1.0, %v3556_v39  ;;  %v3357_v41 = vpack.c.bf16 %v959_v38, %v958_v37 }
 0x366   :  { %3358 = vmatpush3.bf16.msra.mxu0 %v3357_v41  ;;  %v960_v45 = vmul.f32 %v957_v40, %v948_v44 }
 0x367   :  { %3026 = vmatprep.subr.mxu0 %v3720_v1 }
 0x36a   :  { %3027 = vmatpush3.msk.msra.mxu0 %vm540_vm2, %v960_v45 }
 0x36b   :  { %3029 = vmatmul.mubr.msk.f32.vlgmr.msra.gmra.mrb[26].mxu0 %vm961_vm5, %v628_v46  ;;  %3359 = vmatprep.subr.bf16.mxu0 %v3718_v0 }
 0x36c   :  { %3031 = vmatprep.mubr.msk.f32.mxu0 %vm3719_vm0, %v3720_v1  ;;  %3361 = vmatpush3.bf16.msra.mxu0 %v3360_v47  ;;  %v2566_v47 = vld [vmem:[%s4522_s8] ss:$0 sm:$0xff] }
 0x36d   :  { %3362 = vmatprep.subr.bf16.mxu0 %v3718_v0 }
 0x36f   :  { %3032 = vmatmul.mubr.msk.f32.gmra.mrb[28].mxu0 %vm961_vm5, %v629_v48 }
 0x370   :  { %3034 = vmatprep.mubr.msk.f32.mxu0 %vm3719_vm0, %v3720_v1  ;;  %3364 = vmatpush3.bf16.msra.mxu0 %v3363_v52 }
 0x371   :  { %3365 = vmatprep.subr.bf16.mxu0 %v3718_v0 }
 0x373   :  { %3035 = vmatmul.mubr.msk.f32.gmra.mrb[30].mxu0 %vm961_vm5, %v630_v49 }
 0x374   :  { %3053 = vmatprep.mubr.msk.f32.mxu0 %vm3719_vm0, %v3720_v1  ;;  %3367 = vmatpush3.bf16.msra.mxu0 %v3366_v58 }
 0x375   :  { %3368 = vmatprep.subr.bf16.mxu0 %v3718_v0 }
 0x378   :  { %3370 = vmatpush3.bf16.msra.mxu0 %v3369_v2 }
 0x379   :  { %3383 = vmatprep.subr.bf16.mxu0 %v3718_v0 }
 0x43e   :  { %v1040_v3 = vpop.f32.mrb[26].mxu0 }
 0x43f   :  { %1054 = vst.msk [vmem:[#allocation3] sm:$0xff] %vm158_vm1, %v1040_v3  ;;  %v3030_v4 = vpop.f32.mrb[27].mxu0 }
 0x442   :  { %v1045_v5 = vpop.f32.mrb[28].mxu0 }
 0x443   :  { %1055 = vst.msk [vmem:[#allocation3 + $0x8] sm:$0xff] %vm158_vm1, %v1045_v5  ;;  %v3033_v6 = vpop.f32.mrb[29].mxu0 }
 0x446   :  { %v1050_v9 = vpop.f32.mrb[30].mxu0  ;;  %v1059_v10 = vld [vmem:[#allocation3] sm:$0xff] }
 0x447   :  { %1056 = vst.msk [vmem:[#allocation3 + $0x10] sm:$0xf] %vm626_vm4, %v1050_v9  ;;  %3079 = vmatmul.mubr.msk.f32.vlgmr.msra.gmra.mrb[28].mxu1 %vm158_vm1, %v1059_v10  ;;  %v3036_v11 = vpop.f32.mrb[31].mxu0 }
 0x448   :  { %3081 = vmatprep.mubr.msk.f32.mxu1 %vm3719_vm0, %v3720_v1 }
 0x44a   :  { %v1070_v15 = vld [vmem:[#allocation3 + $0x1] sm:$0xff] }
 0x44b   :  { %v1060_v16 = vld [vmem:[#allocation3 + $0x8] sm:$0xff]  ;;  %3054 = vmatmul.mubr.msk.f32.vlgmr.msra.gmra.mrb[32].mxu0 %vm158_vm1, %v1070_v15  ;;  %v2572_v15 = vld [vmem:[%s4524_s10 + $0x50] sm:$0xff] }
 0x44c   :  { %3082 = vmatmul.mubr.msk.f32.gmra.mrb[30].mxu1 %vm158_vm1, %v1060_v16  ;;  %3385 = vmatpush3.bf16.msra.mxu0 %v3384_v12  ;;  %v1260_v27 = vld [vmem:[#allocation3 + $0x2] sm:$0xff] }
 0x44d   :  { %3056 = vmatprep.mubr.msk.f32.mxu0 %vm3719_vm0, %v3720_v1  ;;  %3386 = vmatprep.subr.bf16.mxu0 %v3718_v0  ;;  %v2570_v12 = vld [vmem:[%s4524_s10 + $0x40] sm:$0xff]  ;;  %v2573_v16 = vld [vmem:[%s4524_s10 + $0x58] sm:$0xff] }
 0x44e   :  { %3084 = vmatprep.mubr.msk.f32.mxu1 %vm3719_vm0, %v3720_v1  ;;  %v1071_v20 = vld [vmem:[#allocation3 + $0x9] sm:$0xff]  ;;  %v1072_v22 = vld [vmem:[#allocation3 + $0x11] sm:$0x3]  ;;  %v3403_v19 = vpack.c.bf16 %v2573_v16, %v2572_v15 }
 0x44f   :  { %v1061_v21 = vld [vmem:[#allocation3 + $0x10] sm:$0x3]  ;;  %3057 = vmatmul.mubr.msk.f32.gmra.mrb[34].mxu0 %vm158_vm1, %v1071_v20  ;;  %v1262_v29 = vld [vmem:[#allocation3 + $0x12] sm:$0x3]  ;;  %v2574_v20 = vld [vmem:[%s4524_s10 + $0x60] sm:$0xff] }
 0x450   :  { %3085 = vmatmul.mubr.msk.f32.gmra.mrb[32].mxu1 %vm158_vm1, %v1061_v21  ;;  %3388 = vmatpush3.bf16.msra.mxu0 %v3387_v17  ;;  %v1261_v28 = vld [vmem:[#allocation3 + $0xa] sm:$0xff]  ;;  %v3399_v17 = vpack.c.bf16 %v2571_v13, %v2570_v12 }
 0x451   :  { %3059 = vmatprep.mubr.msk.f32.mxu0 %vm3719_vm0, %v3720_v1  ;;  %3389 = vmatprep.subr.bf16.mxu0 %v3718_v0  ;;  %v2575_v21 = vld [vmem:[%s4524_s10 + $0x68] sm:$0xff] }
 0x452   :  { %3118 = vmatprep.mubr.msk.f32.mxu1 %vm961_vm5, %v1057_v30 }
 0x453   :  { %3060 = vmatmul.mubr.msk.f32.gmra.mrb[36].mxu0 %vm158_vm1, %v1072_v22  ;;  %v3407_v22 = vpack.c.bf16 %v2575_v21, %v2574_v20  ;;  %v1476_v20 = vld [vmem:[#allocation14 + $0x8] sm:$0xf]  ;;  %v2600_v21 = vld [vmem:[%s4527_s13 + $0x60] sm:$0xff] }
 0x454   :  { %3391 = vmatpush3.bf16.msra.mxu0 %v3390_v23  ;;  %3103 = vmatprep.mubr.msk.f32.mxu0 %vm3719_vm0, %v3720_v1  ;;  %v2576_v23 = vld [vmem:[%s4524_s10 + $0x70] sm:$0xff] }
 0x455   :  { %3392 = vmatprep.subr.bf16.mxu0 %v3718_v0  ;;  %v3411_v25 = vpack.c.bf16 %v2577_v24, %v2576_v23  ;;  %v2602_v24 = vld [vmem:[%s4527_s13 + $0x70] sm:$0xff] }
 0x458   :  { %3394 = vmatpush3.bf16.msra.mxu0 %v3393_v26  ;;  %v1479_v26 = vld [vmem:[%s4524_s10] sm:$0xff] }
 0x45b   :  { %3104 = vmatmul.mubr.msk.f32.vlgmr.msra.gmra.mrb[38].mxu0 %vm158_vm1, %v1260_v27  ;;  %v1480_v27 = vld [vmem:[%s4524_s10 + $0x8] sm:$0xff] }
 0x45c   :  { %3106 = vmatprep.mubr.msk.f32.mxu0 %vm3719_vm0, %v3720_v1 }
 0x45f   :  { %3107 = vmatmul.mubr.msk.f32.gmra.mrb[40].mxu0 %vm158_vm1, %v1261_v28  ;;  %v3415_v28 = vpack.c.bf16 %v1480_v27, %v1479_v26  ;;  %v1862_v27 = vld [vmem:[%s4527_s13] sm:$0xff] }
 0x460   :  { %3109 = vmatprep.mubr.msk.f32.mxu0 %vm3719_vm0, %v3720_v1 }
 0x463   :  { %3110 = vmatmul.mubr.msk.f32.gmra.mrb[42].mxu0 %vm158_vm1, %v1262_v29 }
 0x51a   :  { %v1246_v31 = vpop.f32.mrb[28].mxu1 }
 0x51b   :  { %v3080_v32 = vpop.f32.mrb[29].mxu1 }
 0x51c   :  { %v1482_v32 = vld [vmem:[%s4524_s10 + $0x18] sm:$0xff] }
 0x51e   :  { %v1157_v33 = vpop.f32.mrb[32].mxu0 }
 0x51f   :  { %v1251_v34 = vpop.f32.mrb[30].mxu1  ;;  %v1247_v35 = vadd.f32 %v1246_v31, %v1157_v33  ;;  %v3055_v36 = vpop.f32.mrb[33].mxu0  ;;  %v1481_v31 = vld [vmem:[%s4524_s10 + $0x10] sm:$0xff] }
 0x520   :  { %v3083_v37 = vpop.f32.mrb[31].mxu1  ;;  %v1483_v36 = vld [vmem:[%s4524_s10 + $0x20] sm:$0xff] }
 0x521   :  { %v1484_v37 = vld [vmem:[%s4524_s10 + $0x28] sm:$0xff] }
 0x522   :  { %v1162_v38 = vpop.f32.mrb[34].mxu0 }
 0x523   :  { %v1256_v39 = vpop.f32.mrb[32].mxu1  ;;  %v1252_v40 = vadd.f32 %v1251_v34, %v1162_v38  ;;  %v3058_v41 = vpop.f32.mrb[35].mxu0  ;;  %v3419_v34 = vpack.c.bf16 %v1482_v32, %v1481_v31  ;;  %v1864_v32 = vld [vmem:[%s4527_s13 + $0x10] sm:$0xff] }
 0x524   :  { %v3086_v42 = vpop.f32.mrb[33].mxu1  ;;  %v1486_v41 = vld [vmem:[%s4524_s10 + $0x38] sm:$0xff] }
 0x526   :  { %v1167_v43 = vpop.f32.mrb[36].mxu0 }
 0x527   :  { %v1257_v44 = vadd.f32 %v1256_v39, %v1167_v43  ;;  %v3061_v45 = vpop.f32.mrb[37].mxu0  ;;  %v3423_v39 = vpack.c.bf16 %v1484_v37, %v1483_v36  ;;  %v2582_v43 = vld [vmem:[%s4524_s10 + $0x80] sm:$0xff] }
 0x528   :  { %v1866_v37 = vld [vmem:[%s4527_s13 + $0x20] sm:$0xff] }
 0x52e   :  { %v1347_v46 = vpop.f32.mrb[38].mxu0 }
 0x52f   :  { %v1361_v48 = vadd.f32 %v1347_v46, %v1247_v35  ;;  %v3105_v49 = vpop.f32.mrb[39].mxu0  ;;  %v2584_v46 = vld [vmem:[%s4524_s10 + $0x90] sm:$0xff] }
 0x531   :  { %v1371_v50 = vadd.f32 %v2566_v47, %v1361_v48 }
 0x532   :  { %v1352_v51 = vpop.f32.mrb[40].mxu0 }
 0x533   :  { %v1377_v52 = vmul.f32 0.70710677, %v1371_v50  ;;  %v1362_v53 = vadd.f32 %v1352_v51, %v1252_v40  ;;  %v3108_v54 = vpop.f32.mrb[41].mxu0  ;;  %v1374_v3 = vmul.f32 0.5, %v1371_v50  ;;  %v1485_v40 = vld [vmem:[%s4524_s10 + $0x30] sm:$0xff]  ;;  %v2586_v50 = vld [vmem:[%s4524_s10 + $0xa0] sm:$0xff] }
 0x534   :  { %v3427_v42 = vpack.c.bf16 %v1486_v41, %v1485_v40  ;;  %v2587_v51 = vld [vmem:[%s4524_s10 + $0xa8] sm:$0xff]  ;;  %v2588_v54 = vld [vmem:[%s4524_s10 + $0xb0] sm:$0xff] }
 0x535   :  { %3557 = verf.f32 %v1377_v52  ;;  %v1372_v55 = vadd.f32 %v2566_v47, %v1362_v53  ;;  %v3439_v53 = vpack.c.bf16 %v2587_v51, %v2586_v50  ;;  %v1868_v41 = vld [vmem:[%s4527_s13 + $0x30] sm:$0xff]  ;;  %v2612_v51 = vld [vmem:[%s4527_s13 + $0xa0] sm:$0xff] }
 0x536   :  { %v1357_v56 = vpop.f32.mrb[42].mxu0 }
 0x537   :  { %v1378_v57 = vmul.f32 0.70710677, %v1372_v55  ;;  %v1363_v58 = vadd.f32 %v1357_v56, %v1257_v44  ;;  %v3111_v59 = vpop.f32.mrb[43].mxu0  ;;  %v1375_v4 = vmul.f32 0.5, %v1372_v55  ;;  %v2583_v44 = vld [vmem:[%s4524_s10 + $0x88] sm:$0xff]  ;;  %v2589_v55 = vld [vmem:[%s4524_s10 + $0xb8] sm:$0xff] }
 0x538   :  { %v3431_v45 = vpack.c.bf16 %v2583_v44, %v2582_v43  ;;  %v3443_v56 = vpack.c.bf16 %v2589_v55, %v2588_v54  ;;  %v2596_v59 = vld [vmem:[%s4527_s13 + $0x40] sm:$0xff]  ;;  %v2614_v55 = vld [vmem:[%s4527_s13 + $0xb0] sm:$0xff] }
 0x539   :  { %3559 = verf.f32 %v1378_v57  ;;  %v1373_v60 = vadd.f32 %v2566_v47, %v1363_v58  ;;  %v2585_v47 = vld [vmem:[%s4524_s10 + $0x98] sm:$0xff]  ;;  %v1475_v58 = vld [vmem:[#allocation14] sm:$0xff]  ;;  %v2608_v44 = vld [vmem:[%s4527_s13 + $0x80] sm:$0xff] }
 0x53a   :  { %v3435_v48 = vpack.c.bf16 %v2585_v47, %v2584_v46  ;;  %v2610_v47 = vld [vmem:[%s4527_s13 + $0x90] sm:$0xff] }
 0x53b   :  { %v1379_v61 = vmul.f32 0.70710677, %v1373_v60  ;;  %v1376_v9 = vmul.f32 0.5, %v1373_v60  ;;  %v2597_v60 = vld [vmem:[%s4527_s13 + $0x48] sm:$0xff] }
 0x53d   :  { %3561 = verf.f32 %v1379_v61  ;;  %v2598_v61 = vld [vmem:[%s4527_s13 + $0x50] sm:$0xff] }
 0x53f   :  { %v3558_v62 = vpop.eup %3557 }
 0x540   :  { %v1383_v63 = vadd.f32 1.0, %v3558_v62  ;;  %v3453_v62 = vpack.c.bf16 %v2597_v60, %v2596_v59  ;;  %v2618_v59 = vld [vmem:[%s4528_s14] ss:$0 sm:$0xff] }
 0x542   :  { %v1386_v6 = vmul.f32 %v1383_v63, %v1374_v3  ;;  %v2599_v63 = vld [vmem:[%s4527_s13 + $0x58] sm:$0xff]  ;;  %3454 = vmatprep.subr.bf16.mxu0 %v3453_v62  ;;  %v2592_v3 = vld [vmem:[%s4525_s11] ss:$0 sm:$0xff] }
 0x543   :  { %v3560_v2 = vpop.eup %3559  ;;  %3456 = vmatpush3.bf16.msra.mxu0 %v3453_v62 }
 0x544   :  { %v1384_v5 = vadd.f32 1.0, %v3560_v2  ;;  %v3457_v2 = vpack.c.bf16 %v2599_v63, %v2598_v61 }
 0x546   :  { %v1387_v7 = vmul.f32 %v1384_v5, %v1375_v4  ;;  %3458 = vmatprep.subr.bf16.mxu0 %v3457_v2 }
 0x547   :  { %v3562_v8 = vpop.eup %3561  ;;  %3460 = vmatpush3.bf16.msra.mxu0 %v3457_v2 }
 0x548   :  { %v1385_v10 = vadd.f32 1.0, %v3562_v8  ;;  %v3395_v11 = vpack.c.bf16 %v1387_v7, %v1386_v6 }
 0x54a   :  { %v1388_v14 = vmul.f32 %v1385_v10, %v1376_v9  ;;  %3396 = vmatprep.subr.bf16.mxu1 %v3395_v11 }
 0x54b   :  { %3398 = vmatpush3.bf16.msra.mxu1 %v3395_v11 }
 0x54c   :  { %3116 = vmatprep.subr.msk.mxu1 %vm540_vm2, %v1388_v14 }
 0x54f   :  { %3117 = vmatpush3.msk.msra.mxu1 %vm540_vm2, %v1388_v14 }
 0x550   :  { %3119 = vmatmul.mubr.msk.f32.vlgmr.msra.gmra.mrb[34].mxu1 %vm961_vm5, %v1058_v18  ;;  %3400 = vmatprep.subr.bf16.mxu1 %v3399_v17  ;;  %v2627_v18 = vld [vmem:[%s4530_s16 + $0x38] sm:$0xff] }
 0x551   :  { %3402 = vmatpush3.bf16.msra.mxu1 %v3399_v17 }
 0x552   :  { %3404 = vmatprep.subr.bf16.mxu1 %v3403_v19 }
 0x555   :  { %3406 = vmatpush3.bf16.msra.mxu1 %v3403_v19 }
 0x556   :  { %3408 = vmatprep.subr.bf16.mxu1 %v3407_v22 }
 0x559   :  { %3410 = vmatpush3.bf16.msra.mxu1 %v3407_v22  ;;  %v2601_v22 = vld [vmem:[%s4527_s13 + $0x68] sm:$0xff] }
 0x55a   :  { %3412 = vmatprep.subr.bf16.mxu1 %v3411_v25  ;;  %v3461_v23 = vpack.c.bf16 %v2601_v22, %v2600_v21  ;;  %v2626_v22 = vld [vmem:[%s4530_s16 + $0x30] sm:$0xff] }
 0x55c   :  { %3462 = vmatprep.subr.bf16.mxu0 %v3461_v23 }
 0x55d   :  { %3414 = vmatpush3.bf16.msra.mxu1 %v3411_v25  ;;  %v2603_v25 = vld [vmem:[%s4527_s13 + $0x78] sm:$0xff]  ;;  %3464 = vmatpush3.bf16.msra.mxu0 %v3461_v23  ;;  %v2235_v23 = vld [vmem:[%s4530_s16 + $0x10] sm:$0xff] }
 0x55e   :  { %3416 = vmatprep.subr.bf16.mxu1 %v3415_v28  ;;  %v3465_v26 = vpack.c.bf16 %v2603_v25, %v2602_v24  ;;  %v2236_v24 = vld [vmem:[%s4530_s16 + $0x18] sm:$0xff]  ;;  %v3513_v25 = vpack.c.bf16 %v2627_v18, %v2626_v22 }
 0x560   :  { %3466 = vmatprep.subr.bf16.mxu0 %v3465_v26 }
 0x561   :  { %3468 = vmatpush3.bf16.msra.mxu0 %v3465_v26  ;;  %v3519_v26 = vpack.c.bf16 %v2236_v24, %v2235_v23 }
 0x623   :  { %v3120_v29 = vpop.f32.mrb[34].mxu1 }
 0x624   :  { %1474 = vst.msk [vmem:[#allocation4 + $0x8] sm:$0xf] %vm626_vm4, %v3120_v29  ;;  %v1464_v30 = vpop.f32.mrb[35].mxu1 }
 0x625   :  { %1473 = vst.msk [vmem:[#allocation4] sm:$0xff] %vm158_vm1, %v1464_v30 }
 0x62b   :  { %v1488_v35 = vld [vmem:[#allocation4 + $0x9] sm:$0x3] }
 0x62c   :  { %v1487_v33 = vld [vmem:[#allocation4 + $0x1] sm:$0xff]  ;;  %v1661_v57 = vld [vmem:[#allocation4 + $0xa] sm:$0x3] }
 0x62d   :  { %3137 = vmatprep.mubr.msk.f32.mxu1 %vm158_vm1, %v1487_v33  ;;  %v1477_v38 = vld [vmem:[#allocation4] sm:$0xff]  ;;  %v1478_v49 = vld [vmem:[#allocation4 + $0x8] sm:$0x3] }
 0x62e   :  { %3138 = vmatmul.mubr.msk.f32.vlgmr.msra.gmra.mrb[36].mxu1 %vm158_vm1, %v1488_v35  ;;  %v1660_v52 = vld [vmem:[#allocation4 + $0x2] sm:$0xff] }
 0x62f   :  { %3418 = vmatpush3.bf16.msra.mxu1 %v3415_v28  ;;  %3156 = vmatprep.mubr.msk.f32.mxu1 %vm158_vm1, %v1477_v38  ;;  %v1863_v28 = vld [vmem:[%s4527_s13 + $0x8] sm:$0xff]  ;;  %v1865_v33 = vld [vmem:[%s4527_s13 + $0x18] sm:$0xff] }
 0x630   :  { %3420 = vmatprep.subr.bf16.mxu1 %v3419_v34  ;;  %v3469_v29 = vpack.c.bf16 %v1863_v28, %v1862_v27  ;;  %v3473_v35 = vpack.c.bf16 %v1865_v33, %v1864_v32  ;;  %v1867_v38 = vld [vmem:[%s4527_s13 + $0x28] sm:$0xff] }
 0x631   :  { %v3477_v40 = vpack.c.bf16 %v1867_v38, %v1866_v37 }
 0x632   :  { %3470 = vmatprep.subr.bf16.mxu0 %v3469_v29 }
 0x633   :  { %3422 = vmatpush3.bf16.msra.mxu1 %v3419_v34 }
 0x634   :  { %3424 = vmatprep.subr.bf16.mxu1 %v3423_v39 }
 0x637   :  { %3426 = vmatpush3.bf16.msra.mxu1 %v3423_v39 }
 0x638   :  { %3428 = vmatprep.subr.bf16.mxu1 %v3427_v42 }
 0x63b   :  { %3430 = vmatpush3.bf16.msra.mxu1 %v3427_v42  ;;  %v1869_v42 = vld [vmem:[%s4527_s13 + $0x38] sm:$0xff] }
 0x63c   :  { %3432 = vmatprep.subr.bf16.mxu1 %v3431_v45  ;;  %v3481_v43 = vpack.c.bf16 %v1869_v42, %v1868_v41 }
 0x63e   :  { %3157 = vmatmul.mubr.msk.f32.vlgmr.msra.gmra.mrb[36].mxu1 %vm158_vm1, %v1478_v49 }
 0x63f   :  { %3434 = vmatpush3.bf16.msra.mxu1 %v3431_v45  ;;  %3175 = vmatprep.mubr.msk.f32.mxu1 %vm158_vm1, %v1660_v52  ;;  %v2609_v45 = vld [vmem:[%s4527_s13 + $0x88] sm:$0xff] }
 0x640   :  { %3436 = vmatprep.subr.bf16.mxu1 %v3435_v48  ;;  %v3485_v46 = vpack.c.bf16 %v2609_v45, %v2608_v44  ;;  %v2613_v52 = vld [vmem:[%s4527_s13 + $0xa8] sm:$0xff] }
 0x641   :  { %v3493_v54 = vpack.c.bf16 %v2613_v52, %v2612_v51 }
 0x643   :  { %3438 = vmatpush3.bf16.msra.mxu1 %v3435_v48  ;;  %v2611_v48 = vld [vmem:[%s4527_s13 + $0x98] sm:$0xff] }
 0x644   :  { %3440 = vmatprep.subr.bf16.mxu1 %v3439_v53  ;;  %v3489_v49 = vpack.c.bf16 %v2611_v48, %v2610_v47 }
 0x647   :  { %3442 = vmatpush3.bf16.msra.mxu1 %v3439_v53 }
 0x648   :  { %3444 = vmatprep.subr.bf16.mxu1 %v3443_v56 }
 0x64b   :  { %3446 = vmatpush3.bf16.msra.mxu1 %v3443_v56  ;;  %v2615_v56 = vld [vmem:[%s4527_s13 + $0xb8] sm:$0xff] }
 0x64e   :  { %3176 = vmatmul.mubr.msk.f32.vlgmr.msra.gmra.mrb[36].mxu1 %vm158_vm1, %v1661_v57  ;;  %v3497_v57 = vpack.c.bf16 %v2615_v56, %v2614_v55 }
 0x64f   :  { %3182 = vmatprep.mubr.msk.f32.mxu1 %vm1773_vm6, %v1475_v58 }
 0x721   :  { %v3177_v4 = vpop.f32.mrb[36].mxu1 }
 0x722   :  { %v1762_v5 = vadd.f32 %v3177_v4, %v2592_v3  ;;  %v1743_v6 = vpop.f32.mrb[37].mxu1 }
 0x723   :  { %v1761_v7 = vadd.f32 %v2592_v3, %v1743_v6 }
 0x724   :  { %v1766_v8 = vmul.f32 0.70710677, %v1762_v5  ;;  %v1764_v12 = vmul.f32 0.5, %v1762_v5 }
 0x725   :  { %v1765_v9 = vmul.f32 0.70710677, %v1761_v7  ;;  %v1763_v14 = vmul.f32 0.5, %v1761_v7 }
 0x726   :  { %3563 = verf.f32 %v1766_v8 }
 0x727   :  { %3565 = verf.f32 %v1765_v9 }
 0x730   :  { %v3564_v10 = vpop.eup %3563 }
 0x731   :  { %v3566_v11 = vpop.eup %3565  ;;  %v1770_v13 = vadd.f32 1.0, %v3564_v10 }
 0x732   :  { %v1769_v15 = vadd.f32 1.0, %v3566_v11 }
 0x733   :  { %v1772_v16 = vmul.f32 %v1770_v13, %v1764_v12  ;;  %v2624_v12 = vld [vmem:[%s4530_s16 + $0x20] sm:$0xff]  ;;  %v2625_v13 = vld [vmem:[%s4530_s16 + $0x28] sm:$0xff] }
 0x734   :  { %v1771_v17 = vmul.f32 %v1769_v15, %v1763_v14  ;;  %v2233_v14 = vld [vmem:[%s4530_s16] sm:$0xff]  ;;  %v2234_v15 = vld [vmem:[%s4530_s16 + $0x8] sm:$0xff] }
 0x735   :  { %v3516_v21 = vpack.c.bf16 %v2234_v15, %v2233_v14 }
 0x736   :  { %v3447_v19 = vpack.c.bf16 %v1772_v16, %v1771_v17  ;;  %v2156_v17 = vld [vmem:[%s4529_s15] sm:$0x3] }
 0x738   :  { %3449 = vmatprep.subr.msk.bf16.mxu1 %vm4369_vm8, %v3447_v19 }
 0x739   :  { %3452 = vmatpush3.bf16.msk.msra.mxu1 %vm4369_vm8, %v3447_v19  ;;  %v2621_v19 = vld [vmem:[%s4529_s15 + $0x2] sm:$0x3] }
 0x73a   :  { %3505 = vmatprep.subr.bf16.mxu1 %v3718_v0 }
 0x73c   :  { %3183 = vmatmul.mubr.msk.f32.vlgmr.msra.gmra.mrb[38].mxu1 %vm1773_vm6, %v1476_v20  ;;  %v3510_v20 = vpack.c.bf16 %v2625_v13, %v2624_v12 }
 0x73d   :  { %3253 = vmatprep.mubr.msk.f32.mxu1 %vm3719_vm0, %v3720_v1 }
 0x80f   :  { %v3184_v30 = vpop.f32.mrb[38].mxu1 }
 0x810   :  { %1859 = vst.msk [vmem:[#allocation5 + $0x8] sm:$0xf] %vm626_vm4, %v3184_v30  ;;  %v1849_v31 = vpop.f32.mrb[39].mxu1 }
 0x811   :  { %1858 = vst.msk [vmem:[#allocation5] sm:$0xff] %vm158_vm1, %v1849_v31 }
 0x817   :  { %v1871_v36 = vld [vmem:[#allocation5 + $0x9] sm:$0x3] }
 0x818   :  { %v1870_v34 = vld [vmem:[#allocation5 + $0x1] sm:$0xff]  ;;  %v2044_v58 = vld [vmem:[#allocation5 + $0xa] sm:$0x3] }
 0x819   :  { %3201 = vmatprep.mubr.msk.f32.mxu0 %vm158_vm1, %v1870_v34  ;;  %v1860_v39 = vld [vmem:[#allocation5] sm:$0xff]  ;;  %v1861_v50 = vld [vmem:[#allocation5 + $0x8] sm:$0x3] }
 0x81a   :  { %3202 = vmatmul.mubr.msk.f32.vlgmr.msra.gmra.mrb[44].mxu0 %vm158_vm1, %v1871_v36  ;;  %v2043_v53 = vld [vmem:[#allocation5 + $0x2] sm:$0xff] }
 0x81b   :  { %3472 = vmatpush3.bf16.msra.mxu0 %v3469_v29  ;;  %3220 = vmatprep.mubr.msk.f32.mxu0 %vm158_vm1, %v1860_v39 }
 0x81c   :  { %3474 = vmatprep.subr.bf16.mxu0 %v3473_v35 }
 0x81f   :  { %3476 = vmatpush3.bf16.msra.mxu0 %v3473_v35 }
 0x820   :  { %3478 = vmatprep.subr.bf16.mxu0 %v3477_v40 }
 0x823   :  { %3480 = vmatpush3.bf16.msra.mxu0 %v3477_v40 }
 0x824   :  { %3482 = vmatprep.subr.bf16.mxu0 %v3481_v43 }
 0x827   :  { %3484 = vmatpush3.bf16.msra.mxu0 %v3481_v43 }
 0x828   :  { %3486 = vmatprep.subr.bf16.mxu0 %v3485_v46 }
 0x82a   :  { %3221 = vmatmul.mubr.msk.f32.vlgmr.msra.gmra.mrb[44].mxu0 %vm158_vm1, %v1861_v50 }
 0x82b   :  { %3488 = vmatpush3.bf16.msra.mxu0 %v3485_v46  ;;  %3239 = vmatprep.mubr.msk.f32.mxu0 %vm158_vm1, %v2043_v53 }
 0x82c   :  { %3490 = vmatprep.subr.bf16.mxu0 %v3489_v49 }
 0x82f   :  { %3492 = vmatpush3.bf16.msra.mxu0 %v3489_v49 }
 0x830   :  { %3494 = vmatprep.subr.bf16.mxu0 %v3493_v54 }
 0x833   :  { %3496 = vmatpush3.bf16.msra.mxu0 %v3493_v54 }
 0x834   :  { %3498 = vmatprep.subr.bf16.mxu0 %v3497_v57 }
 0x837   :  { %3500 = vmatpush3.bf16.msra.mxu0 %v3497_v57 }
 0x838   :  { %3501 = vmatprep.subr.bf16.mxu0 %v3718_v0 }
 0x83a   :  { %3240 = vmatmul.mubr.msk.f32.vlgmr.msra.gmra.mrb[44].mxu0 %vm158_vm1, %v2044_v58 }
 0x83b   :  { %3246 = vmatprep.mubr.msk.f32.mxu0 %vm3719_vm0, %v3720_v1 }
 0x90d   :  { %v3241_v60 = vpop.f32.mrb[44].mxu0 }
 0x90e   :  { %v2145_v61 = vadd.f32 %v3241_v60, %v2618_v59  ;;  %v2126_v62 = vpop.f32.mrb[45].mxu0 }
 0x90f   :  { %v2144_v63 = vadd.f32 %v2618_v59, %v2126_v62 }
 0x910   :  { %v2149_v2 = vmul.f32 0.70710677, %v2145_v61  ;;  %v2147_v6 = vmul.f32 0.5, %v2145_v61 }
 0x911   :  { %v2148_v3 = vmul.f32 0.70710677, %v2144_v63  ;;  %v2146_v8 = vmul.f32 0.5, %v2144_v63 }
 0x912   :  { %3567 = verf.f32 %v2149_v2 }
 0x913   :  { %3569 = verf.f32 %v2148_v3 }
 0x91c   :  { %v3568_v4 = vpop.eup %3567 }
 0x91d   :  { %v3570_v5 = vpop.eup %3569  ;;  %v2153_v7 = vadd.f32 1.0, %v3568_v4 }
 0x91e   :  { %v2152_v9 = vadd.f32 1.0, %v3570_v5 }
 0x91f   :  { %v2155_v10 = vmul.f32 %v2153_v7, %v2147_v6 }
 0x920   :  { %v2154_v11 = vmul.f32 %v2152_v9, %v2146_v8 }
 0x922   :  { %v3502_v16 = vpack.c.bf16 %v2155_v10, %v2154_v11 }
 0x924   :  { %3504 = vmatpush3.bf16.msk.msra.mxu0 %vm4369_vm8, %v3502_v16  ;;  %3508 = vmatpush3.bf16.msk.msra.mxu1 %vm4369_vm8, %v3502_v16 }
 0x925   :  { %3509 = vmatprep.subr.bf16.mxu1 %v3718_v0  ;;  %3515 = vmatprep.subr.bf16.mxu0 %v3718_v0 }
 0x927   :  { %3247 = vmatmul.mubr.msk.f32.vlgmr.msra.gmra.mrb[46].mxu0 %vm1773_vm6, %v2156_v17  ;;  %3254 = vmatmul.mubr.msk.f32.vlgmr.msra.gmra.mrb[40].mxu1 %vm1773_vm6, %v2621_v19 }
 0x928   :  { %3511 = vmatpush3.bf16.msra.mxu1 %v3510_v20  ;;  %3517 = vmatpush3.bf16.msra.mxu0 %v3516_v21 }
 0x929   :  { %3512 = vmatprep.subr.bf16.mxu1 %v3718_v0  ;;  %3518 = vmatprep.subr.bf16.mxu0 %v3718_v0  ;;  %v2630_v0 = vld [vmem:[%s4531_s17] ss:$0 sm:$0xff] }
 0x92a   :  { %3264 = vmatprep.mubr.msk.f32.mxu1 %vm3719_vm0, %v3720_v1  ;;  %3275 = vmatprep.mubr.msk.f32.mxu0 %vm3719_vm0, %v3720_v1 }
 0x92c   :  { %3514 = vmatpush3.bf16.msra.mxu1 %v3513_v25  ;;  %3520 = vmatpush3.bf16.msra.mxu0 %v3519_v26 }
 0x9fa   :  { %v2229_v27 = vpop.f32.mrb[46].mxu0  ;;  %v2308_v28 = vpop.f32.mrb[40].mxu1 }
 0x9fb   :  { %v3248_v29 = vpop.f32.mrb[47].mxu0  ;;  %v3255_v30 = vpop.f32.mrb[41].mxu1  ;;  %3265 = vmatmul.mubr.msk.f32.vlgmr.msra.gmra.mrb[42].mxu1 %vm2317_vm9, %v2308_v28  ;;  %3276 = vmatmul.mubr.msk.f32.vlgmr.msra.gmra.mrb[48].mxu0 %vm2317_vm9, %v2229_v27 }
 0xace   :  { %v2387_v31 = vpop.f32.mrb[42].mxu1  ;;  %v2460_v32 = vpop.f32.mrb[48].mxu0 }
 0xacf   :  { %v2461_v33 = vadd.f32 %v2460_v32, %v2387_v31  ;;  %v3266_v34 = vpop.f32.mrb[43].mxu1  ;;  %v3277_v1 = vpop.f32.mrb[49].mxu0 }
 0xad1   :  { %v2471_v35 = vadd.f32 %v2630_v0, %v2461_v33 }
 0xad3   :  { %2473 = vst.msk [vmem:[#allocation15] sm:$0x3] %vm2472_vm10, %v2471_v35 }
 0xad4   :  { %3692 = shalt.err (!%p3689_p2)
}
 0xad5   :  { %s4545_s1 = sld [smem:[#allocation23_spill]] }
 0xadb   :  { %s3693_s17 = scalar_lea.hbm %s4545_s1, 32 }
 0xadc   :  { %p3694_p3 = scmp.ne.s32.totalorder %s4545_s1, %s3693_s17  ;;  %p3697_p4 = scmp.lt.u32.totalorder %s3693_s17, %s4545_s1 }
 0xade   :  { %p3699_p5 = pnand %p3697_p4, %p3694_p3 }
 0xae0   :  { %3702 = shalt.err (!%p3699_p5)
}
 0xae1   :  { %2483 = dma.vmem_to_hbm [thread:$0]  %s2481_s19, 32, %s4545_s1, [#allocation8]  }
 0xae2   :  { %3709 = dma.done.wait [#allocation8], 32  }
 0xae3   :  { %3710 = vsyncadd [#allocation8], 4294967264 }
 0xae4   :  { %2487 = vsyncpa [#allocation7], 1 }
 0xae5   :  { %2488 = vsyncpa [#allocation10], 1 }
 0xae6   :  { %2489 = vsyncpa [#allocation13], 1 }
 0xae7   :  { %2490 = vsyncpa [#allocation8], 1 }

</bundles_post_ra>
